<compile_context>
chip_gen: v5e
topology: v5e:2x2
jax: 0.10.0
libtpu: 0.0.40
codegen_flags: <defaults>
</compile_context>

<pallas_src>
import functools
import math

import jax
import jax.numpy as jnp
from jax.experimental import pallas as pl
from jax.experimental.pallas import tpu as pltpu


# ----------------------------- config ---------------------------------------
class Config:
    n_embd = 64
    n_head = 4
    n_query_groups = 4
    head_size = 16                      # n_embd // n_head
    block_size = 64
    bias = True
    attention_bias = False
    norm_eps = 1e-5
    norm_qk = False
    use_rope = False                    # GPT-2: learned positional embeddings
    causal_attention = True
    attention_logit_softcapping = None
    parallel_residual = False
    shared_attention_norm = False
    post_attention_norm = False         # -> Identity
    post_mlp_norm = False               # -> Identity
    mlp_hidden = 4 * 64


def _gelu_tanh(h):
    # GPT-2 uses the tanh-approximate GELU.
    c = 0.7978845608028654  # sqrt(2/pi)
    return 0.5 * h * (1.0 + jnp.tanh(c * (h + 0.044715 * h * h * h)))


# ----------------------------- fused Pallas kernel ---------------------------
def _block_kernel(x_ref, ln1_g_ref, ln1_b_ref,
                  wqkv_ref, bqkv_ref, wproj_ref, bproj_ref,
                  ln2_g_ref, ln2_b_ref,
                  wfc_ref, bfc_ref, wpr_ref, bpr_ref,
                  o_ref, qkv_scr, *,
                  n_head, n_query_groups, head_size, seq_len, tq, eps,
                  causal, softcap, parallel_residual, shared_attention_norm,
                  compute_dtype):
    T, hs, nh, ng, cd = seq_len, head_size, n_head, n_query_groups, compute_dtype
    q_idx = pl.program_id(1)

    def layernorm(t, g_ref, b_ref):
        mu = jnp.mean(t, axis=-1, keepdims=True)
        tc = t - mu
        var = jnp.mean(tc * tc, axis=-1, keepdims=True)
        return tc * jax.lax.rsqrt(var + eps) * g_ref[...] + b_ref[...]

    # ---- once per batch element (first q-tile): LN1 + fused QKV projection ----
    # One (T, C) x (C, G*hs) matmul; result kept resident in VMEM scratch so every
    # q-tile of this batch reuses K/V (and its own Q rows) without recompute.
    @pl.when(q_idx == 0)
    def _():
        x_all = x_ref[...].astype(jnp.float32)                         # (T, C)
        xn = layernorm(x_all, ln1_g_ref, ln1_b_ref)
        qkv = jnp.dot(xn.astype(cd), wqkv_ref[...],
                      preferred_element_type=jnp.float32) + bqkv_ref[...]
        qkv_scr[...] = qkv.astype(qkv_scr.dtype)
        # TODO(synk): RoPE / QK-norm (use_rope=False, norm_qk=False for gpt2-small) not fused here.

    # ---- per q-tile: attention + proj + residual + LN2 + MLP ----
    row0 = pl.multiple_of(q_idx * tq, tq)
    x_tile = x_ref[pl.ds(row0, tq), :].astype(jnp.float32)             # (tq, C)

    if causal:
        rows = row0 + jax.lax.broadcasted_iota(jnp.int32, (tq, T), 0)
        cols = jax.lax.broadcasted_iota(jnp.int32, (tq, T), 1)
        future = cols > rows                                           # (tq, T)

    rep = nh // ng
    k_off = nh * hs
    v_off = (nh + ng) * hs

    ys = []
    for h in range(nh):                                                # static unroll
        g = h // rep                                                   # GQA group
        q_h = qkv_scr[pl.ds(row0, tq), pl.ds(h * hs, hs)]              # (tq, hs)
        k_h = qkv_scr[pl.ds(0, T), pl.ds(k_off + g * hs, hs)]          # (T, hs)
        v_h = qkv_scr[pl.ds(0, T), pl.ds(v_off + g * hs, hs)]          # (T, hs)
        # 1/sqrt(hs) is already folded into the Q weight/bias host-side.
        s = jax.lax.dot_general(q_h, k_h,
                                dimension_numbers=(((1,), (1,)), ((), ())),
                                preferred_element_type=jnp.float32)    # (tq, T) f32
        if softcap is not None:
            s = jnp.tanh(s / softcap) * softcap
        if causal:
            s = jnp.where(future, -jnp.inf, s)
        s = s - jnp.max(s, axis=-1, keepdims=True)                     # diag unmasked -> safe
        p = jnp.exp(s)                                                 # f32
        inv_l = pl.reciprocal(jnp.sum(p, axis=-1, keepdims=True), approx=True)  # EUP
        y_h = jnp.dot(p.astype(cd), v_h,
                      preferred_element_type=jnp.float32) * inv_l      # (tq, hs) f32
        ys.append(y_h)
    y = jnp.concatenate(ys, axis=-1)                                   # (tq, nh*hs)

    # Flat output projection: one K=nh*hs matmul, no per-head matmuls / head-sum.
    attn_out = jnp.dot(y.astype(cd), wproj_ref[...],
                       preferred_element_type=jnp.float32) + bproj_ref[...]   # (tq, C)
    # post_attention_norm is Identity for this config.

    def mlp(t):
        hcur = jnp.dot(t.astype(cd), wfc_ref[...],
                       preferred_element_type=jnp.float32) + bfc_ref[...]
        hcur = _gelu_tanh(hcur)                                        # f32
        return jnp.dot(hcur.astype(cd), wpr_ref[...],
                       preferred_element_type=jnp.float32) + bpr_ref[...]

    if parallel_residual:
        if shared_attention_norm:
            xn2 = layernorm(x_tile, ln1_g_ref, ln1_b_ref)
        else:
            xn2 = layernorm(x_tile, ln2_g_ref, ln2_b_ref)
        out = attn_out + mlp(xn2) + x_tile
    else:
        xr = x_tile + attn_out
        xn2 = layernorm(xr, ln2_g_ref, ln2_b_ref)
        # Reference Block: x = self.mlp(x_normed) (NO second residual add) — kept exact.
        out = mlp(xn2)
    # post_mlp_norm is Identity for this config.

    o_ref[...] = out.astype(o_ref.dtype)        # one (tq, C) store per grid step
    # NOTE: C=64 < 128 lanes => masked store; lane-dense at the real C=768 config.


# ----------------------------- Block forward wrapper --------------------------
def block_forward(x, p, cfg, compute_dtype=jnp.bfloat16, tq=16):
    """Fused transformer block as a single pallas_call, grid over (batch, q-tiles)."""
    B, T, C = x.shape
    nh, ng, hs = cfg.n_head, cfg.n_query_groups, cfg.head_size
    G = nh + 2 * ng
    H = cfg.mlp_hidden
    cd = compute_dtype
    assert T % tq == 0 and tq % 8 == 0, (T, tq)
    nq = T // tq
    qs = nh * hs
    scale = 1.0 / math.sqrt(hs)

    # Host-side one-time weight prep:
    #  * fold attention scale into Q weight/bias (valid since norm_qk=False),
    #  * keep qkv_w in its original flat (C, G*hs) layout,
    #  * proj_w stays flat (nh*hs, C) so the head-sum lives inside the MXU.
    wqkv = jnp.concatenate([p["qkv_w"][:, :qs] * scale, p["qkv_w"][:, qs:]],
                           axis=1).astype(cd)                               # (C, G*hs)
    bqkv = jnp.concatenate([p["qkv_b"][:qs] * scale, p["qkv_b"][qs:]]
                           ).reshape(1, G * hs).astype(jnp.float32)         # (1, G*hs)

    args = (
        x,
        p["ln1_g"].reshape(1, C), p["ln1_b"].reshape(1, C),
        wqkv, bqkv,
        p["proj_w"].astype(cd), p["proj_b"].reshape(1, C),
        p["ln2_g"].reshape(1, C), p["ln2_b"].reshape(1, C),
        p["fc_w"].astype(cd), p["fc_b"].reshape(1, H),
        p["proj2_w"].astype(cd), p["proj2_b"].reshape(1, C),
    )

    def resident_spec(a):
        nd = a.ndim
        # Constant block index -> fetched once, stays resident across the grid.
        # TODO(synk): at real sizes, single-buffer these via pipeline_mode=pl.Buffered(1).
        return pl.BlockSpec(a.shape, lambda b, q, _nd=nd: (0,) * _nd)

    in_specs = [pl.BlockSpec((pl.Squeezed(), T, C), lambda b, q: (b, 0, 0))]
    in_specs += [resident_spec(a) for a in args[1:]]

    kernel = functools.partial(
        _block_kernel,
        n_head=nh, n_query_groups=ng, head_size=hs, seq_len=T, tq=tq,
        eps=cfg.norm_eps, causal=cfg.causal_attention,
        softcap=cfg.attention_logit_softcapping,
        parallel_residual=cfg.parallel_residual,
        shared_attention_norm=cfg.shared_attention_norm,
        compute_dtype=cd,
    )

    return pl.pallas_call(
        kernel,
        grid=(B, nq),
        in_specs=in_specs,
        out_specs=pl.BlockSpec((pl.Squeezed(), tq, C), lambda b, q: (b, q, 0)),
        out_shape=jax.ShapeDtypeStruct((B, T, C), x.dtype),
        scratch_shapes=[pltpu.VMEM((T, G * hs), cd)],     # fused QKV, resident per batch
        compiler_params=pltpu.CompilerParams(
            dimension_semantics=("parallel", "arbitrary"),  # batch shards over v7x cores
            vmem_limit_bytes=32 * 1024 * 1024),
    )(*args)


# ----------------------------- pure-JAX reference (sanity check) -------------
def block_reference(x, p, cfg):
    B, T, C = x.shape
    hp = jax.lax.Precision.HIGHEST

    def ln(t, g, b):
        mu = jnp.mean(t, axis=-1, keepdims=True)
        var = jnp.mean((t - mu) ** 2, axis=-1, keepdims=True)
        return (t - mu) * jax.lax.rsqrt(var + cfg.norm_eps) * g + b

    xn = ln(x, p["ln1_g"], p["ln1_b"])
    qkv = jnp.einsum("btc,cd->btd", xn, p["qkv_w"], precision=hp) + p["qkv_b"]
    qs = cfg.n_head * cfg.head_size
    kv = cfg.n_query_groups * cfg.head_size
    q, k, v = qkv[..., :qs], qkv[..., qs:qs + kv], qkv[..., qs + kv:]
    q = q.reshape(B, T, cfg.n_head, cfg.head_size).transpose(0, 2, 1, 3)
    k = k.reshape(B, T, cfg.n_query_groups, cfg.head_size).transpose(0, 2, 1, 3)
    v = v.reshape(B, T, cfg.n_query_groups, cfg.head_size).transpose(0, 2, 1, 3)
    if cfg.n_query_groups != cfg.n_head:
        rep = cfg.n_head // cfg.n_query_groups
        k = jnp.repeat(k, rep, axis=1)
        v = jnp.repeat(v, rep, axis=1)
    s = jnp.einsum("bhqd,bhkd->bhqk", q, k, precision=hp) / math.sqrt(cfg.head_size)
    mask = jnp.triu(jnp.ones((T, T), dtype=bool), k=1)
    s = jnp.where(mask[None, None], -jnp.inf, s)
    w = jax.nn.softmax(s, axis=-1)
    y = jnp.einsum("bhqk,bhkd->bhqd", w, v, precision=hp)
    y = y.transpose(0, 2, 1, 3).reshape(B, T, cfg.n_head * cfg.head_size)
    attn_out = jnp.einsum("btc,cd->btd", y, p["proj_w"], precision=hp) + p["proj_b"]

    def mlp_ref(t):
        h = jnp.einsum("btc,ch->bth", t, p["fc_w"], precision=hp) + p["fc_b"]
        h = _gelu_tanh(h)
        return jnp.einsum("bth,hc->btc", h, p["proj2_w"], precision=hp) + p["proj2_b"]

    if cfg.parallel_residual:
        xn2 = xn if cfg.shared_attention_norm else ln(x, p["ln2_g"], p["ln2_b"])
        return attn_out + mlp_ref(xn2) + x
    xr = x + attn_out
    xn2 = ln(xr, p["ln2_g"], p["ln2_b"])
    return mlp_ref(xn2)


# ----------------------------- params ----------------------------------------
def init_params(key, cfg):
    C = cfg.n_embd
    qkv_out = (cfg.n_head + 2 * cfg.n_query_groups) * cfg.head_size
    H = cfg.mlp_hidden
    ks = jax.random.split(key, 8)

    def w(k, shape):
        return 0.02 * jax.random.normal(k, shape, jnp.float32)

    return {
        "ln1_g": jnp.ones((C,), jnp.float32), "ln1_b": jnp.zeros((C,), jnp.float32),
        "ln2_g": jnp.ones((C,), jnp.float32), "ln2_b": jnp.zeros((C,), jnp.float32),
        # weights stored as (in, out) == PyTorch weight.T; qkv columns ordered
        # [all Q heads | all K groups | all V groups] consistent with the kernel.
        "qkv_w": w(ks[0], (C, qkv_out)), "qkv_b": w(ks[1], (qkv_out,)),
        "proj_w": w(ks[2], (cfg.n_head * cfg.head_size, C)), "proj_b": w(ks[3], (C,)),
        "fc_w": w(ks[4], (C, H)), "fc_b": w(ks[5], (H,)),
        "proj2_w": w(ks[6], (H, C)), "proj2_b": w(ks[7], (C,)),
    }


# ----------------------------- main -------------------------------------------
if __name__ == "__main__":
    cfg = Config()
    B, T = 2, cfg.block_size          # T=64 with tq=16 -> grid (2, 4): 8 pipelined steps
    key = jax.random.PRNGKey(0)
    kx, kp = jax.random.split(key)
    x = jax.random.normal(kx, (B, T, cfg.n_embd), jnp.float32)
    params = init_params(kp, cfg)

    ref = block_reference(x, params, cfg)

    # f32-MXU path: checked tightly against the pure-JAX reference.
    out = jax.block_until_ready(block_forward(x, params, cfg, jnp.float32))
    assert out.shape == (B, T, cfg.n_embd), out.shape
    assert bool(jnp.all(jnp.isfinite(out)))
    if not bool(jnp.allclose(out, ref, atol=3e-3, rtol=2e-2)):
        raise SystemExit(
            f"f32 mismatch vs reference, max abs err = {float(jnp.max(jnp.abs(out - ref)))}")

    # bf16 MXU-operand path (default; v6e/v7x recommendation): f32 accumulation;
    # LayerNorm / softmax / GELU stay in f32.
    out_bf = jax.block_until_ready(block_forward(x, params, cfg, jnp.bfloat16))
    assert bool(jnp.all(jnp.isfinite(out_bf)))
    if not bool(jnp.allclose(out_bf, ref, atol=5e-2, rtol=5e-2)):
        raise SystemExit(
            f"bf16 mismatch vs reference, max abs err = {float(jnp.max(jnp.abs(out_bf - ref)))}")

    print("KERNEL_OK")
</pallas_src>

<mosaic_0001>
module attributes {stable_mosaic.version = 11 : i64} {
  func.func @_block_kernel(%arg0: i32, %arg1: i32, %arg2: memref<1x64x64xf32, #tpu.memory_space<vmem>>, %arg3: memref<1x64xf32, #tpu.memory_space<vmem>>, %arg4: memref<1x64xf32, #tpu.memory_space<vmem>>, %arg5: memref<64x192xf32, #tpu.memory_space<vmem>>, %arg6: memref<1x192xf32, #tpu.memory_space<vmem>>, %arg7: memref<64x64xf32, #tpu.memory_space<vmem>>, %arg8: memref<1x64xf32, #tpu.memory_space<vmem>>, %arg9: memref<1x64xf32, #tpu.memory_space<vmem>>, %arg10: memref<1x64xf32, #tpu.memory_space<vmem>>, %arg11: memref<64x256xf32, #tpu.memory_space<vmem>>, %arg12: memref<1x256xf32, #tpu.memory_space<vmem>>, %arg13: memref<256x64xf32, #tpu.memory_space<vmem>>, %arg14: memref<1x64xf32, #tpu.memory_space<vmem>>, %arg15: memref<1x16x64xf32, #tpu.memory_space<vmem>>, %arg16: memref<64x192xf32, #tpu.memory_space<vmem>>) attributes {dimension_semantics = [#tpu.dimension_semantics<parallel>, #tpu.dimension_semantics<arbitrary>], iteration_bounds = array<i64: 2, 4>, scalar_prefetch = 0 : i64, scratch_operands = 1 : i64, tpu.core_type = #tpu.core_type<tc>, window_params = [{transform_indices = @transform_0, window_bounds = array<i64: 1, 64, 64>}, {pipeline_mode = #tpu.pipeline_mode<synchronous>, transform_indices = @transform_1, window_bounds = array<i64: 1, 64>}, {pipeline_mode = #tpu.pipeline_mode<synchronous>, transform_indices = @transform_2, window_bounds = array<i64: 1, 64>}, {pipeline_mode = #tpu.pipeline_mode<synchronous>, transform_indices = @transform_3, window_bounds = array<i64: 64, 192>}, {pipeline_mode = #tpu.pipeline_mode<synchronous>, transform_indices = @transform_4, window_bounds = array<i64: 1, 192>}, {pipeline_mode = #tpu.pipeline_mode<synchronous>, transform_indices = @transform_5, window_bounds = array<i64: 64, 64>}, {pipeline_mode = #tpu.pipeline_mode<synchronous>, transform_indices = @transform_6, window_bounds = array<i64: 1, 64>}, {pipeline_mode = #tpu.pipeline_mode<synchronous>, transform_indices = @transform_7, window_bounds = array<i64: 1, 64>}, {pipeline_mode = #tpu.pipeline_mode<synchronous>, transform_indices = @transform_8, window_bounds = array<i64: 1, 64>}, {pipeline_mode = #tpu.pipeline_mode<synchronous>, transform_indices = @transform_9, window_bounds = array<i64: 64, 256>}, {pipeline_mode = #tpu.pipeline_mode<synchronous>, transform_indices = @transform_10, window_bounds = array<i64: 1, 256>}, {pipeline_mode = #tpu.pipeline_mode<synchronous>, transform_indices = @transform_11, window_bounds = array<i64: 256, 64>}, {pipeline_mode = #tpu.pipeline_mode<synchronous>, transform_indices = @transform_12, window_bounds = array<i64: 1, 64>}, {transform_indices = @transform_13, window_bounds = array<i64: 1, 16, 64>}]} {
    %c0_i32 = arith.constant 0 : i32
    %0 = arith.cmpi eq, %arg1, %c0_i32 : i32
    %1 = arith.extui %0 : i1 to i32
    %c0_i32_0 = arith.constant 0 : i32
    %2 = arith.cmpi ne, %1, %c0_i32_0 : i32
    scf.if %2 {
      %c0_61 = arith.constant 0 : index
      %c0_62 = arith.constant 0 : index
      %c0_63 = arith.constant 0 : index
      %140 = vector.load %arg2[%c0_61, %c0_62, %c0_63] : memref<1x64x64xf32, #tpu.memory_space<vmem>>, vector<1x64x64xf32>
      %141 = vector.shape_cast %140 : vector<1x64x64xf32> to vector<64x64xf32>
      %cst_64 = arith.constant dense<0.000000e+00> : vector<64xf32>
      %142 = vector.multi_reduction <add>, %141, %cst_64 [1] : vector<64x64xf32> to vector<64xf32>
      %143 = vector.shape_cast %142 : vector<64xf32> to vector<64x1xf32>
      %cst_65 = arith.constant 6.400000e+01 : f32
      %144 = vector.broadcast %cst_65 : f32 to vector<64x1xf32>
      %145 = arith.divf %143, %144 : vector<64x1xf32>
      %146 = vector.broadcast %145 : vector<64x1xf32> to vector<64x64xf32>
      %147 = arith.subf %141, %146 : vector<64x64xf32>
      %148 = arith.mulf %147, %147 : vector<64x64xf32>
      %cst_66 = arith.constant dense<0.000000e+00> : vector<64xf32>
      %149 = vector.multi_reduction <add>, %148, %cst_66 [1] : vector<64x64xf32> to vector<64xf32>
      %150 = vector.shape_cast %149 : vector<64xf32> to vector<64x1xf32>
      %cst_67 = arith.constant 6.400000e+01 : f32
      %151 = vector.broadcast %cst_67 : f32 to vector<64x1xf32>
      %152 = arith.divf %150, %151 : vector<64x1xf32>
      %cst_68 = arith.constant 9.99999974E-6 : f32
      %153 = vector.broadcast %cst_68 : f32 to vector<64x1xf32>
      %154 = arith.addf %152, %153 : vector<64x1xf32>
      %155 = math.rsqrt %154 : vector<64x1xf32>
      %156 = vector.broadcast %155 : vector<64x1xf32> to vector<64x64xf32>
      %157 = arith.mulf %147, %156 : vector<64x64xf32>
      %c0_69 = arith.constant 0 : index
      %c0_70 = arith.constant 0 : index
      %158 = vector.load %arg3[%c0_69, %c0_70] : memref<1x64xf32, #tpu.memory_space<vmem>>, vector<1x64xf32>
      %159 = vector.broadcast %158 : vector<1x64xf32> to vector<64x64xf32>
      %160 = arith.mulf %157, %159 : vector<64x64xf32>
      %c0_71 = arith.constant 0 : index
      %c0_72 = arith.constant 0 : index
      %161 = vector.load %arg4[%c0_71, %c0_72] : memref<1x64xf32, #tpu.memory_space<vmem>>, vector<1x64xf32>
      %162 = vector.broadcast %161 : vector<1x64xf32> to vector<64x64xf32>
      %163 = arith.addf %160, %162 : vector<64x64xf32>
      %c0_73 = arith.constant 0 : index
      %c0_74 = arith.constant 0 : index
      %164 = vector.load %arg5[%c0_73, %c0_74] : memref<64x192xf32, #tpu.memory_space<vmem>>, vector<64x192xf32>
      %cst_75 = arith.constant dense<0.000000e+00> : vector<64x192xf32>
      %165 = tpu.matmul %163, %164, %cst_75 {dimension_numbers = #tpu.dot_dimension_numbers<[1], [0], [0], [1], [0, 0, 1, 1], [], []>} : vector<64x64xf32>, vector<64x192xf32>, vector<64x192xf32> -> vector<64x192xf32>
      %c0_76 = arith.constant 0 : index
      %c0_77 = arith.constant 0 : index
      %166 = vector.load %arg6[%c0_76, %c0_77] : memref<1x192xf32, #tpu.memory_space<vmem>>, vector<1x192xf32>
      %167 = vector.broadcast %166 : vector<1x192xf32> to vector<64x192xf32>
      %168 = arith.addf %165, %167 : vector<64x192xf32>
      %c0_78 = arith.constant 0 : index
      %c0_79 = arith.constant 0 : index
      %169 = vector.load %arg16[%c0_78, %c0_79] : memref<64x192xf32, #tpu.memory_space<vmem>>, vector<64x192xf32>
      tpu.vector_store %arg16[%c0_78, %c0_79], %168 {strides = array<i32>} : memref<64x192xf32, #tpu.memory_space<vmem>>, vector<64x192xf32>,
    } else {
    }
    %c16_i32 = arith.constant 16 : i32
    %3 = arith.muli %arg1, %c16_i32 : i32
    %4 = tpu.assume_multiple %3, 16 : i32
    %c0 = arith.constant 0 : index
    %5 = arith.index_cast %4 : i32 to index
    %c0_1 = arith.constant 0 : index
    %6 = vector.load %arg2[%c0, %5, %c0_1] : memref<1x64x64xf32, #tpu.memory_space<vmem>>, vector<1x16x64xf32>
    %7 = vector.shape_cast %6 : vector<1x16x64xf32> to vector<16x64xf32>
    %8 = tpu.iota {dimensions = array<i32: 0>} : vector<16x64xi32>
    %9 = vector.broadcast %4 : i32 to vector<16x64xi32>
    %10 = arith.addi %9, %8 : vector<16x64xi32>
    %11 = tpu.iota {dimensions = array<i32: 1>} : vector<16x64xi32>
    %12 = arith.cmpi sgt, %11, %10 : vector<16x64xi32>
    %13 = arith.index_cast %4 : i32 to index
    %c0_2 = arith.constant 0 : index
    %14 = vector.load %arg16[%13, %c0_2] : memref<64x192xf32, #tpu.memory_space<vmem>>, vector<16x16xf32>
    %c0_3 = arith.constant 0 : index
    %c64 = arith.constant 64 : index
    %15 = vector.load %arg16[%c0_3, %c64] : memref<64x192xf32, #tpu.memory_space<vmem>>, vector<64x16xf32>
    %c0_4 = arith.constant 0 : index
    %c128 = arith.constant 128 : index
    %16 = vector.load %arg16[%c0_4, %c128] : memref<64x192xf32, #tpu.memory_space<vmem>>, vector<64x16xf32>
    %cst = arith.constant dense<0.000000e+00> : vector<16x64xf32>
    %17 = tpu.matmul %14, %15, %cst {dimension_numbers = #tpu.dot_dimension_numbers<[1], [1], [0], [0], [0, 0, 1, 0], [], []>} : vector<16x16xf32>, vector<64x16xf32>, vector<16x64xf32> -> vector<16x64xf32>
    %cst_5 = arith.constant 0xFF800000 : f32
    %18 = vector.broadcast %cst_5 : f32 to vector<16x64xf32>
    %19 = arith.select %12, %18, %17 : vector<16x64xi1>, vector<16x64xf32>
    %cst_6 = arith.constant dense<0xFF800000> : vector<16xf32>
    %20 = vector.multi_reduction <maximumf>, %19, %cst_6 [1] : vector<16x64xf32> to vector<16xf32>
    %21 = vector.shape_cast %20 : vector<16xf32> to vector<16x1xf32>
    %22 = vector.broadcast %21 : vector<16x1xf32> to vector<16x64xf32>
    %23 = arith.subf %19, %22 : vector<16x64xf32>
    %24 = math.exp %23 : vector<16x64xf32>
    %cst_7 = arith.constant dense<0.000000e+00> : vector<16xf32>
    %25 = vector.multi_reduction <add>, %24, %cst_7 [1] : vector<16x64xf32> to vector<16xf32>
    %26 = vector.shape_cast %25 : vector<16xf32> to vector<16x1xf32>
    %27 = tpu.reciprocal %26 {approx = true} : vector<16x1xf32> -> vector<16x1xf32>
    %cst_8 = arith.constant dense<0.000000e+00> : vector<16x16xf32>
    %28 = tpu.matmul %24, %16, %cst_8 {dimension_numbers = #tpu.dot_dimension_numbers<[1], [0], [0], [1], [0, 0, 1, 1], [], []>} : vector<16x64xf32>, vector<64x16xf32>, vector<16x16xf32> -> vector<16x16xf32>
    %29 = vector.broadcast %27 : vector<16x1xf32> to vector<16x16xf32>
    %30 = arith.mulf %28, %29 : vector<16x16xf32>
    %31 = arith.index_cast %4 : i32 to index
    %c16 = arith.constant 16 : index
    %32 = vector.load %arg16[%31, %c16] : memref<64x192xf32, #tpu.memory_space<vmem>>, vector<16x16xf32>
    %c0_9 = arith.constant 0 : index
    %c80 = arith.constant 80 : index
    %33 = vector.load %arg16[%c0_9, %c80] : memref<64x192xf32, #tpu.memory_space<vmem>>, vector<64x16xf32>
    %c0_10 = arith.constant 0 : index
    %c144 = arith.constant 144 : index
    %34 = vector.load %arg16[%c0_10, %c144] : memref<64x192xf32, #tpu.memory_space<vmem>>, vector<64x16xf32>
    %cst_11 = arith.constant dense<0.000000e+00> : vector<16x64xf32>
    %35 = tpu.matmul %32, %33, %cst_11 {dimension_numbers = #tpu.dot_dimension_numbers<[1], [1], [0], [0], [0, 0, 1, 0], [], []>} : vector<16x16xf32>, vector<64x16xf32>, vector<16x64xf32> -> vector<16x64xf32>
    %cst_12 = arith.constant 0xFF800000 : f32
    %36 = vector.broadcast %cst_12 : f32 to vector<16x64xf32>
    %37 = arith.select %12, %36, %35 : vector<16x64xi1>, vector<16x64xf32>
    %cst_13 = arith.constant dense<0xFF800000> : vector<16xf32>
    %38 = vector.multi_reduction <maximumf>, %37, %cst_13 [1] : vector<16x64xf32> to vector<16xf32>
    %39 = vector.shape_cast %38 : vector<16xf32> to vector<16x1xf32>
    %40 = vector.broadcast %39 : vector<16x1xf32> to vector<16x64xf32>
    %41 = arith.subf %37, %40 : vector<16x64xf32>
    %42 = math.exp %41 : vector<16x64xf32>
    %cst_14 = arith.constant dense<0.000000e+00> : vector<16xf32>
    %43 = vector.multi_reduction <add>, %42, %cst_14 [1] : vector<16x64xf32> to vector<16xf32>
    %44 = vector.shape_cast %43 : vector<16xf32> to vector<16x1xf32>
    %45 = tpu.reciprocal %44 {approx = true} : vector<16x1xf32> -> vector<16x1xf32>
    %cst_15 = arith.constant dense<0.000000e+00> : vector<16x16xf32>
    %46 = tpu.matmul %42, %34, %cst_15 {dimension_numbers = #tpu.dot_dimension_numbers<[1], [0], [0], [1], [0, 0, 1, 1], [], []>} : vector<16x64xf32>, vector<64x16xf32>, vector<16x16xf32> -> vector<16x16xf32>
    %47 = vector.broadcast %45 : vector<16x1xf32> to vector<16x16xf32>
    %48 = arith.mulf %46, %47 : vector<16x16xf32>
    %49 = arith.index_cast %4 : i32 to index
    %c32 = arith.constant 32 : index
    %50 = vector.load %arg16[%49, %c32] : memref<64x192xf32, #tpu.memory_space<vmem>>, vector<16x16xf32>
    %c0_16 = arith.constant 0 : index
    %c96 = arith.constant 96 : index
    %51 = vector.load %arg16[%c0_16, %c96] : memref<64x192xf32, #tpu.memory_space<vmem>>, vector<64x16xf32>
    %c0_17 = arith.constant 0 : index
    %c160 = arith.constant 160 : index
    %52 = vector.load %arg16[%c0_17, %c160] : memref<64x192xf32, #tpu.memory_space<vmem>>, vector<64x16xf32>
    %cst_18 = arith.constant dense<0.000000e+00> : vector<16x64xf32>
    %53 = tpu.matmul %50, %51, %cst_18 {dimension_numbers = #tpu.dot_dimension_numbers<[1], [1], [0], [0], [0, 0, 1, 0], [], []>} : vector<16x16xf32>, vector<64x16xf32>, vector<16x64xf32> -> vector<16x64xf32>
    %cst_19 = arith.constant 0xFF800000 : f32
    %54 = vector.broadcast %cst_19 : f32 to vector<16x64xf32>
    %55 = arith.select %12, %54, %53 : vector<16x64xi1>, vector<16x64xf32>
    %cst_20 = arith.constant dense<0xFF800000> : vector<16xf32>
    %56 = vector.multi_reduction <maximumf>, %55, %cst_20 [1] : vector<16x64xf32> to vector<16xf32>
    %57 = vector.shape_cast %56 : vector<16xf32> to vector<16x1xf32>
    %58 = vector.broadcast %57 : vector<16x1xf32> to vector<16x64xf32>
    %59 = arith.subf %55, %58 : vector<16x64xf32>
    %60 = math.exp %59 : vector<16x64xf32>
    %cst_21 = arith.constant dense<0.000000e+00> : vector<16xf32>
    %61 = vector.multi_reduction <add>, %60, %cst_21 [1] : vector<16x64xf32> to vector<16xf32>
    %62 = vector.shape_cast %61 : vector<16xf32> to vector<16x1xf32>
    %63 = tpu.reciprocal %62 {approx = true} : vector<16x1xf32> -> vector<16x1xf32>
    %cst_22 = arith.constant dense<0.000000e+00> : vector<16x16xf32>
    %64 = tpu.matmul %60, %52, %cst_22 {dimension_numbers = #tpu.dot_dimension_numbers<[1], [0], [0], [1], [0, 0, 1, 1], [], []>} : vector<16x64xf32>, vector<64x16xf32>, vector<16x16xf32> -> vector<16x16xf32>
    %65 = vector.broadcast %63 : vector<16x1xf32> to vector<16x16xf32>
    %66 = arith.mulf %64, %65 : vector<16x16xf32>
    %67 = arith.index_cast %4 : i32 to index
    %c48 = arith.constant 48 : index
    %68 = vector.load %arg16[%67, %c48] : memref<64x192xf32, #tpu.memory_space<vmem>>, vector<16x16xf32>
    %c0_23 = arith.constant 0 : index
    %c112 = arith.constant 112 : index
    %69 = vector.load %arg16[%c0_23, %c112] : memref<64x192xf32, #tpu.memory_space<vmem>>, vector<64x16xf32>
    %c0_24 = arith.constant 0 : index
    %c176 = arith.constant 176 : index
    %70 = vector.load %arg16[%c0_24, %c176] : memref<64x192xf32, #tpu.memory_space<vmem>>, vector<64x16xf32>
    %cst_25 = arith.constant dense<0.000000e+00> : vector<16x64xf32>
    %71 = tpu.matmul %68, %69, %cst_25 {dimension_numbers = #tpu.dot_dimension_numbers<[1], [1], [0], [0], [0, 0, 1, 0], [], []>} : vector<16x16xf32>, vector<64x16xf32>, vector<16x64xf32> -> vector<16x64xf32>
    %cst_26 = arith.constant 0xFF800000 : f32
    %72 = vector.broadcast %cst_26 : f32 to vector<16x64xf32>
    %73 = arith.select %12, %72, %71 : vector<16x64xi1>, vector<16x64xf32>
    %cst_27 = arith.constant dense<0xFF800000> : vector<16xf32>
    %74 = vector.multi_reduction <maximumf>, %73, %cst_27 [1] : vector<16x64xf32> to vector<16xf32>
    %75 = vector.shape_cast %74 : vector<16xf32> to vector<16x1xf32>
    %76 = vector.broadcast %75 : vector<16x1xf32> to vector<16x64xf32>
    %77 = arith.subf %73, %76 : vector<16x64xf32>
    %78 = math.exp %77 : vector<16x64xf32>
    %cst_28 = arith.constant dense<0.000000e+00> : vector<16xf32>
    %79 = vector.multi_reduction <add>, %78, %cst_28 [1] : vector<16x64xf32> to vector<16xf32>
    %80 = vector.shape_cast %79 : vector<16xf32> to vector<16x1xf32>
    %81 = tpu.reciprocal %80 {approx = true} : vector<16x1xf32> -> vector<16x1xf32>
    %cst_29 = arith.constant dense<0.000000e+00> : vector<16x16xf32>
    %82 = tpu.matmul %78, %70, %cst_29 {dimension_numbers = #tpu.dot_dimension_numbers<[1], [0], [0], [1], [0, 0, 1, 1], [], []>} : vector<16x64xf32>, vector<64x16xf32>, vector<16x16xf32> -> vector<16x16xf32>
    %83 = vector.broadcast %81 : vector<16x1xf32> to vector<16x16xf32>
    %84 = arith.mulf %82, %83 : vector<16x16xf32>
    %85 = tpu.concatenate %30, %48, %66, %84 in 1 : vector<16x16xf32>, vector<16x16xf32>, vector<16x16xf32>, vector<16x16xf32> -> vector<16x64xf32>
    %c0_30 = arith.constant 0 : index
    %c0_31 = arith.constant 0 : index
    %86 = vector.load %arg7[%c0_30, %c0_31] : memref<64x64xf32, #tpu.memory_space<vmem>>, vector<64x64xf32>
    %cst_32 = arith.constant dense<0.000000e+00> : vector<16x64xf32>
    %87 = tpu.matmul %85, %86, %cst_32 {dimension_numbers = #tpu.dot_dimension_numbers<[1], [0], [0], [1], [0, 0, 1, 1], [], []>} : vector<16x64xf32>, vector<64x64xf32>, vector<16x64xf32> -> vector<16x64xf32>
    %c0_33 = arith.constant 0 : index
    %c0_34 = arith.constant 0 : index
    %88 = vector.load %arg8[%c0_33, %c0_34] : memref<1x64xf32, #tpu.memory_space<vmem>>, vector<1x64xf32>
    %89 = vector.broadcast %88 : vector<1x64xf32> to vector<16x64xf32>
    %90 = arith.addf %87, %89 : vector<16x64xf32>
    %91 = arith.addf %7, %90 : vector<16x64xf32>
    %cst_35 = arith.constant dense<0.000000e+00> : vector<16xf32>
    %92 = vector.multi_reduction <add>, %91, %cst_35 [1] : vector<16x64xf32> to vector<16xf32>
    %93 = vector.shape_cast %92 : vector<16xf32> to vector<16x1xf32>
    %cst_36 = arith.constant 6.400000e+01 : f32
    %94 = vector.broadcast %cst_36 : f32 to vector<16x1xf32>
    %95 = arith.divf %93, %94 : vector<16x1xf32>
    %96 = vector.broadcast %95 : vector<16x1xf32> to vector<16x64xf32>
    %97 = arith.subf %91, %96 : vector<16x64xf32>
    %98 = arith.mulf %97, %97 : vector<16x64xf32>
    %cst_37 = arith.constant dense<0.000000e+00> : vector<16xf32>
    %99 = vector.multi_reduction <add>, %98, %cst_37 [1] : vector<16x64xf32> to vector<16xf32>
    %100 = vector.shape_cast %99 : vector<16xf32> to vector<16x1xf32>
    %cst_38 = arith.constant 6.400000e+01 : f32
    %101 = vector.broadcast %cst_38 : f32 to vector<16x1xf32>
    %102 = arith.divf %100, %101 : vector<16x1xf32>
    %cst_39 = arith.constant 9.99999974E-6 : f32
    %103 = vector.broadcast %cst_39 : f32 to vector<16x1xf32>
    %104 = arith.addf %102, %103 : vector<16x1xf32>
    %105 = math.rsqrt %104 : vector<16x1xf32>
    %106 = vector.broadcast %105 : vector<16x1xf32> to vector<16x64xf32>
    %107 = arith.mulf %97, %106 : vector<16x64xf32>
    %c0_40 = arith.constant 0 : index
    %c0_41 = arith.constant 0 : index
    %108 = vector.load %arg9[%c0_40, %c0_41] : memref<1x64xf32, #tpu.memory_space<vmem>>, vector<1x64xf32>
    %109 = vector.broadcast %108 : vector<1x64xf32> to vector<16x64xf32>
    %110 = arith.mulf %107, %109 : vector<16x64xf32>
    %c0_42 = arith.constant 0 : index
    %c0_43 = arith.constant 0 : index
    %111 = vector.load %arg10[%c0_42, %c0_43] : memref<1x64xf32, #tpu.memory_space<vmem>>, vector<1x64xf32>
    %112 = vector.broadcast %111 : vector<1x64xf32> to vector<16x64xf32>
    %113 = arith.addf %110, %112 : vector<16x64xf32>
    %c0_44 = arith.constant 0 : index
    %c0_45 = arith.constant 0 : index
    %114 = vector.load %arg11[%c0_44, %c0_45] : memref<64x256xf32, #tpu.memory_space<vmem>>, vector<64x256xf32>
    %cst_46 = arith.constant dense<0.000000e+00> : vector<16x256xf32>
    %115 = tpu.matmul %113, %114, %cst_46 {dimension_numbers = #tpu.dot_dimension_numbers<[1], [0], [0], [1], [0, 0, 1, 1], [], []>} : vector<16x64xf32>, vector<64x256xf32>, vector<16x256xf32> -> vector<16x256xf32>
    %c0_47 = arith.constant 0 : index
    %c0_48 = arith.constant 0 : index
    %116 = vector.load %arg12[%c0_47, %c0_48] : memref<1x256xf32, #tpu.memory_space<vmem>>, vector<1x256xf32>
    %117 = vector.broadcast %116 : vector<1x256xf32> to vector<16x256xf32>
    %118 = arith.addf %115, %117 : vector<16x256xf32>
    %cst_49 = arith.constant 5.000000e-01 : f32
    %119 = vector.broadcast %cst_49 : f32 to vector<16x256xf32>
    %120 = arith.mulf %119, %118 : vector<16x256xf32>
    %cst_50 = arith.constant 4.471500e-02 : f32
    %121 = vector.broadcast %cst_50 : f32 to vector<16x256xf32>
    %122 = arith.mulf %121, %118 : vector<16x256xf32>
    %123 = arith.mulf %122, %118 : vector<16x256xf32>
    %124 = arith.mulf %123, %118 : vector<16x256xf32>
    %125 = arith.addf %118, %124 : vector<16x256xf32>
    %cst_51 = arith.constant 0.797884583 : f32
    %126 = vector.broadcast %cst_51 : f32 to vector<16x256xf32>
    %127 = arith.mulf %126, %125 : vector<16x256xf32>
    %128 = math.tanh %127 : vector<16x256xf32>
    %cst_52 = arith.constant 1.000000e+00 : f32
    %129 = vector.broadcast %cst_52 : f32 to vector<16x256xf32>
    %130 = arith.addf %129, %128 : vector<16x256xf32>
    %131 = arith.mulf %120, %130 : vector<16x256xf32>
    %c0_53 = arith.constant 0 : index
    %c0_54 = arith.constant 0 : index
    %132 = vector.load %arg13[%c0_53, %c0_54] : memref<256x64xf32, #tpu.memory_space<vmem>>, vector<256x64xf32>
    %cst_55 = arith.constant dense<0.000000e+00> : vector<16x64xf32>
    %133 = tpu.matmul %131, %132, %cst_55 {dimension_numbers = #tpu.dot_dimension_numbers<[1], [0], [0], [1], [0, 0, 1, 1], [], []>} : vector<16x256xf32>, vector<256x64xf32>, vector<16x64xf32> -> vector<16x64xf32>
    %c0_56 = arith.constant 0 : index
    %c0_57 = arith.constant 0 : index
    %134 = vector.load %arg14[%c0_56, %c0_57] : memref<1x64xf32, #tpu.memory_space<vmem>>, vector<1x64xf32>
    %135 = vector.broadcast %134 : vector<1x64xf32> to vector<16x64xf32>
    %136 = arith.addf %133, %135 : vector<16x64xf32>
    %c0_58 = arith.constant 0 : index
    %c0_59 = arith.constant 0 : index
    %c0_60 = arith.constant 0 : index
    %137 = vector.load %arg15[%c0_58, %c0_59, %c0_60] : memref<1x16x64xf32, #tpu.memory_space<vmem>>, vector<1x16x64xf32>
    %138 = vector.shape_cast %137 : vector<1x16x64xf32> to vector<16x64xf32>
    %139 = vector.shape_cast %136 : vector<16x64xf32> to vector<1x16x64xf32>
    tpu.vector_store %arg15[%c0_58, %c0_59, %c0_60], %139 {strides = array<i32>} : memref<1x16x64xf32, #tpu.memory_space<vmem>>, vector<1x16x64xf32>,
    return
  }
  func.func @transform_0(%arg0: i32, %arg1: i32) -> (i32, i32, i32) {
    %c0_i32 = arith.constant 0 : i32
    %c0_i32_0 = arith.constant 0 : i32
    %c0_i32_1 = arith.constant 0 : i32
    return %arg0, %c0_i32, %c0_i32_0 : i32, i32, i32
  }
  func.func @transform_1(%arg0: i32, %arg1: i32) -> (i32, i32) {
    %c0_i32 = arith.constant 0 : i32
    %c0_i32_0 = arith.constant 0 : i32
    %c0_i32_1 = arith.constant 0 : i32
    return %c0_i32, %c0_i32_0 : i32, i32
  }
  func.func @transform_2(%arg0: i32, %arg1: i32) -> (i32, i32) {
    %c0_i32 = arith.constant 0 : i32
    %c0_i32_0 = arith.constant 0 : i32
    %c0_i32_1 = arith.constant 0 : i32
    return %c0_i32, %c0_i32_0 : i32, i32
  }
  func.func @transform_3(%arg0: i32, %arg1: i32) -> (i32, i32) {
    %c0_i32 = arith.constant 0 : i32
    %c0_i32_0 = arith.constant 0 : i32
    %c0_i32_1 = arith.constant 0 : i32
    return %c0_i32, %c0_i32_0 : i32, i32
  }
  func.func @transform_4(%arg0: i32, %arg1: i32) -> (i32, i32) {
    %c0_i32 = arith.constant 0 : i32
    %c0_i32_0 = arith.constant 0 : i32
    %c0_i32_1 = arith.constant 0 : i32
    return %c0_i32, %c0_i32_0 : i32, i32
  }
  func.func @transform_5(%arg0: i32, %arg1: i32) -> (i32, i32) {
    %c0_i32 = arith.constant 0 : i32
    %c0_i32_0 = arith.constant 0 : i32
    %c0_i32_1 = arith.constant 0 : i32
    return %c0_i32, %c0_i32_0 : i32, i32
  }
  func.func @transform_6(%arg0: i32, %arg1: i32) -> (i32, i32) {
    %c0_i32 = arith.constant 0 : i32
    %c0_i32_0 = arith.constant 0 : i32
    %c0_i32_1 = arith.constant 0 : i32
    return %c0_i32, %c0_i32_0 : i32, i32
  }
  func.func @transform_7(%arg0: i32, %arg1: i32) -> (i32, i32) {
    %c0_i32 = arith.constant 0 : i32
    %c0_i32_0 = arith.constant 0 : i32
    %c0_i32_1 = arith.constant 0 : i32
    return %c0_i32, %c0_i32_0 : i32, i32
  }
  func.func @transform_8(%arg0: i32, %arg1: i32) -> (i32, i32) {
    %c0_i32 = arith.constant 0 : i32
    %c0_i32_0 = arith.constant 0 : i32
    %c0_i32_1 = arith.constant 0 : i32
    return %c0_i32, %c0_i32_0 : i32, i32
  }
  func.func @transform_9(%arg0: i32, %arg1: i32) -> (i32, i32) {
    %c0_i32 = arith.constant 0 : i32
    %c0_i32_0 = arith.constant 0 : i32
    %c0_i32_1 = arith.constant 0 : i32
    return %c0_i32, %c0_i32_0 : i32, i32
  }
  func.func @transform_10(%arg0: i32, %arg1: i32) -> (i32, i32) {
    %c0_i32 = arith.constant 0 : i32
    %c0_i32_0 = arith.constant 0 : i32
    %c0_i32_1 = arith.constant 0 : i32
    return %c0_i32, %c0_i32_0 : i32, i32
  }
  func.func @transform_11(%arg0: i32, %arg1: i32) -> (i32, i32) {
    %c0_i32 = arith.constant 0 : i32
    %c0_i32_0 = arith.constant 0 : i32
    %c0_i32_1 = arith.constant 0 : i32
    return %c0_i32, %c0_i32_0 : i32, i32
  }
  func.func @transform_12(%arg0: i32, %arg1: i32) -> (i32, i32) {
    %c0_i32 = arith.constant 0 : i32
    %c0_i32_0 = arith.constant 0 : i32
    %c0_i32_1 = arith.constant 0 : i32
    return %c0_i32, %c0_i32_0 : i32, i32
  }
  func.func @transform_13(%arg0: i32, %arg1: i32) -> (i32, i32, i32) {
    %c0_i32 = arith.constant 0 : i32
    %c0_i32_0 = arith.constant 0 : i32
    return %arg0, %arg1, %c0_i32 : i32, i32, i32
  }
}

</mosaic_0001>

<bundles_post_ra>
// kernel: tpu_custom_call.1
= control target key start
LH: loop header
LB: loop body
LE: loop exit
PB: predicated region body
PF: predicated region fallthrough
CT: control target
= control target key end

     0   :  { %s3512_s0 = inlined_call_operand.vmem [shape: f32[2,64,64], index: 0, kind: input, shape index: {}]   ;;  %s3513_s1 = inlined_call_operand.hbm [shape: f32[1,64], index: 1, kind: input, shape index: {}]   ;;  %s3514_s2 = inlined_call_operand.hbm [shape: f32[1,64], index: 2, kind: input, shape index: {}]   ;;  %s3515_s3 = inlined_call_operand.vmem [shape: f32[64,192], index: 3, kind: input, shape index: {}]   ;;  %s3516_s4 = inlined_call_operand.hbm [shape: f32[1,192], index: 4, kind: input, shape index: {}]   ;;  %s3517_s5 = inlined_call_operand.hbm [shape: f32[64,64], index: 5, kind: input, shape index: {}]   ;;  %s3518_s6 = inlined_call_operand.vmem [shape: f32[1,64], index: 6, kind: input, shape index: {}]   ;;  %s3519_s7 = inlined_call_operand.vmem [shape: f32[1,64], index: 7, kind: input, shape index: {}]   ;;  %s3520_s8 = inlined_call_operand.hbm [shape: f32[1,64], index: 8, kind: input, shape index: {}]   ;;  %s3521_s9 = inlined_call_operand.vmem [shape: f32[64,256], index: 9, kind: input, shape index: {}]   ;;  %s3522_s10 = inlined_call_operand.vmem [shape: f32[1,256], index: 10, kind: input, shape index: {}]   ;;  %s3523_s11 = inlined_call_operand.vmem [shape: f32[256,64], index: 11, kind: input, shape index: {}]   ;;  %s3524_s12 = inlined_call_operand.vmem [shape: f32[1,64], index: 12, kind: input, shape index: {}]   ;;  %s3525_s13 = inlined_call_operand.hbm [shape: f32[2,64,64], index: 13, kind: output, shape index: {}]  }
   0x1   :  { %3538 = sst [smem:[#allocation27_spill]] %s3514_s2 }
   0x2   :  { %3539 = sst [smem:[#allocation28_spill]] %s3517_s5 }
   0x3   :  { %3540 = sst [smem:[#allocation29_spill]] %s3525_s13 }
   0x4   :  { %18 = vsyncpa [#allocation4], 0 }
   0x5   :  { %19 = vsyncpa [#allocation7], 0 }
   0x6   :  { %20 = vsyncpa [#allocation10], 0 }
   0x7   :  { %21 = vsyncpa [#allocation5], 0 }
   0x8   :  { %23 = vsyncpa [#allocation5 + $0x1], 0  ;;  %s2705_s25 = smov 0   ;;  %s2707_s26 = smov 0  }
   0x9   :  { %s2709_s27 = smov 0   ;;  %s2711_s28 = smov 0  }
   0xa   :  { %s2713_s29 = smov 0   ;;  %s2715_s30 = smov 0  }
   0xb   :  { %s2717_s14 = smov 0   ;;  %s2719_s15 = smov 0  }
   0xc LB: > { %3541 = sst [smem:[#allocation17_spill]] %s2587_s25  ;;  %s1962_s16 = sadd.s32 4294967295, %s2615_s15   ;;  %s2615_s15 = sphi %s2719_s15, %s29_s15   ;;  %s2611_s14 = sphi %s2717_s14, %s3574_s14   ;;  %s2607_s30 = sphi %s2715_s30, %s3573_s30   ;;  %s2603_s29 = sphi %s2713_s29, %s3572_s29   ;;  %s2599_s28 = sphi %s2711_s28, %s3571_s28   ;;  %s2595_s27 = sphi %s2709_s27, %s3570_s27   ;;  %s2591_s26 = sphi %s2707_s26, %s3576_s26   ;;  %s2587_s25 = sphi %s2705_s25, %s3575_s25  }
   0xd   : > { %3542 = sst [smem:[#allocation18_spill]] %s2595_s27  ;;  %s1963_s17 = sadd.s32 4294967294, %s2615_s15  }
   0xe   : > { %3543 = sst [smem:[#allocation19_spill]] %s2607_s30  ;;  %s38_s18 = sadd.s32 1, %s2607_s30 }
   0xf   : > { %3544 = sst [smem:[#allocation20_spill]] %s2611_s14  ;;  %s41_s19 = sadd.s32 1, %s2611_s14 }
  0x10   : > { %3545 = sst [smem:[#allocation21_spill]] %s2615_s15  ;;  %p39_p0 = scmp.ge.s32.totalorder %s38_s18, 4 }
  0x11   : > { %s328_s20 = sadd.s32 1, %s2595_s27  ;;  %p338_p1 = scmp.ne.s32.totalorder %s2595_s27, %s2591_s26 }
  0x12   : > { %p339_p2 = scmp.eq.s32.totalorder %s1962_s16, 7  ;;  %s3578_s18 = smov (%p39_p0, %s38_s18), 0 }
  0x13   : > { %3546 = sst [smem:[#allocation22_spill]] %s3578_s18  ;;  %s3580_s19 = smov (!%p39_p0, %s41_s19), %s2611_s14 }
  0x14   : > { %s324_s21 = ssub.s32 %s2607_s30, %s3578_s18  ;;  %p2757_p3 = por %p339_p2, %p338_p1 }
  0x15   : > { %p43_p4 = scmp.ge.s32.totalorder %s3580_s19, 2  ;;  %p344_p5 = scmp.ne.s32.totalorder %s2591_s26, %s2587_s25 }
  0x16   : > { %s3547_s22 = scalar_select %p2757_p3, 1, 0 }
  0x17   : > { %p345_p6 = scmp.eq.s32.totalorder %s1963_s17, 7  ;;  %p1964_p7 = scmp.ge.s32.totalorder %s2615_s15, 1 }
  0x18   : > { %3548 = sst [smem:[#allocation23_spill]] %s3547_s22  ;;  %s3582_s19 = smov (%p43_p4, %s3580_s19), 0 }
  0x19   : > { %3549 = sst [smem:[#allocation24_spill]] %s3582_s19  ;;  %p2766_p8 = por %p345_p6, %p344_p5 }
  0x1a   : > { %p352_p9 = scmp.lt.s32.totalorder %s2615_s15, 9  ;;  %s323_s24 = ssub.s32 %s2611_s14, %s3582_s19 }
  0x1b   : > { %s3550_s23 = scalar_select %p2766_p8, 1, 0 }
  0x1c   : > { %s325_s13 = sor.u32 %s324_s21, %s323_s24  ;;  %p2773_p10 = pnand %p1964_p7, %p352_p9 }
  0x1d   : > { %3551 = sst [smem:[#allocation25_spill]] %s3550_s23  ;;  %p326_p11 = scmp.eq.s32.totalorder %s325_s13, 0 }
  0x1e   : > { %p2777_p12 = scmp.eq.s32.totalorder %s1962_s16, 0  ;;  %p2116_p13 = pneg %p2773_p10 }
  0x1f   : > { %s3554_s2 = sld [smem:[#allocation27_spill]]  ;;  %s2617_s19 = smov [#allocation6]  }
  0x20   : > { %s2787_s15 = scalar_select %p326_p11, %s2595_s27, %s328_s20  }
  0x21   : > { %p2791_p0 = pnand %p2777_p12, %p2116_p13  ;;  %s3557_s5 = sld [smem:[#allocation28_spill]] }
  0x22   : > { %3555 = sst [smem:[#allocation26_spill]] %s2787_s15  ;;  %s378_s14 = sshll.u32 %s2617_s19, 4  ;;  %s379_s14 = int_to_ptr.vmem [resolvable:$true] %s378_s14 }
  0x23   : > { %s2618_s25 = smov [#allocation9]   ;;  %s2619_s17 = smov 128  }
  0x24   : > { %s404_s20 = sshll.u32 %s2618_s25, 4  ;;  %s364_s13 = sshll.u32 %s3513_s1, 4  ;;  %s405_s20 = int_to_ptr.vmem [resolvable:$true] %s404_s20  ;;  %s365_s13 = int_to_ptr.hbm [resolvable:$true] %s364_s13 }
  0x25   : > { %s376_s23 = sshll.u32 %s3554_s2, 4  ;;  %s2620_s2 = smov 8   ;;  %s377_s23 = int_to_ptr.hbm [resolvable:$true] %s376_s23 }
  0x26   : > { %2122 = dma.hbm_to_vmem [thread:$0]  (!%p2791_p0), %s377_s23, 16, %s379_s14, [#allocation7]  }
  0x27   : > { %s402_s24 = sshll.u32 %s3557_s5, 4  ;;  %s2621_s19 = smov [#allocation3]   ;;  %s403_s24 = int_to_ptr.hbm [resolvable:$true] %s402_s24 }
  0x28   : > { %2128 = dma.hbm_to_vmem [thread:$0]  (!%p2791_p0), %s403_s24, 1024, %s405_s20, [#allocation10], %s2619_s17, %s2619_s17, %s2620_s2  }
  0x29   : > { %s366_s16 = sshll.u32 %s2621_s19, 4  ;;  %s391_s14 = sshll.u32 %s3516_s4, 4  ;;  %s367_s16 = int_to_ptr.vmem [resolvable:$true] %s366_s16  ;;  %s392_s14 = int_to_ptr.hbm [resolvable:$true] %s391_s14 }
  0x2a   : > { %2119 = dma.hbm_to_vmem [thread:$0]  (!%p2791_p0), %s365_s13, 16, %s367_s16, [#allocation4]  }
  0x2b   : > { %s423_s2 = sshll.u32 %s3520_s8, 4  ;;  %s2622_s24 = smov [#allocation8]   ;;  %s424_s2 = int_to_ptr.hbm [resolvable:$true] %s423_s2 }
  0x2c   : > { %s393_s20 = sshll.u32 %s2622_s24, 4  ;;  %s2623_s27 = smov [#allocation11]   ;;  %s394_s20 = int_to_ptr.vmem [resolvable:$true] %s393_s20 }
  0x2d   : > { %2125 = dma.hbm_to_vmem [thread:$0]  (!%p2791_p0), %s392_s14, 32, %s394_s20, [#allocation7]  }
  0x2e   : > { %s425_s15 = sshll.u32 %s2623_s27, 4  ;;  %458 = sbr.rel (%p2773_p10) target bundleno = 2154 (0x86a), region = 72  ;;  %s426_s15 = int_to_ptr.vmem [resolvable:$true] %s425_s15 }
  0x2f   : > { %2131 = dma.hbm_to_vmem [thread:$0]  (!%p2791_p0), %s424_s2, 16, %s426_s15, [#allocation10]  }
  0x33   : > { %2570 = dma.done.wait (%p2777_p12), [#allocation4], 16  }
  0x34   : > { %2572 = vsyncadd (%p2777_p12), [#allocation4], 4294967280 }
  0x35   : > { %2574 = dma.done.wait (%p2777_p12), [#allocation7], 48  }
  0x36   : > { %2576 = vsyncadd (%p2777_p12), [#allocation7], 4294967248 }
  0x37   : > { %2578 = dma.done.wait (%p2777_p12), [#allocation10], 1040  }
  0x38   : > { %2580 = vsyncadd (%p2777_p12), [#allocation10], 4294966256  ;;  %s520_s5 = sand.u32 1, %s2591_s26   ;;  %p523_p1 = scmp.lt.s32.totalorder %s2603_s29, 1 }
  0x39   : > { %s1977_s18 = sshll.u32 %s520_s5, 4  ;;  %p1980_p2 = scmp.ne.s32.totalorder %s2599_s28, 0 }
  0x3a   : > { %s524_s22 = scalar_select %p523_p1, %s2603_s29, 1 }
  0x3b   : > { %s2841_s16 = scalar_lea.vmem [#allocation12], %s1977_s18  ;;  %532 = sbr.rel (%p1980_p2) target bundleno = 497 (0x1f1), region = 96 }
  0x3c   : > { %s2060_s21 = sshll.u32 %s524_s22, 6 }
  0x3d   : > { %s2839_s19 = scalar_lea.vmem %s3512_s0, %s2060_s21 }
  0x40   : > { %v539_v0 = vld [vmem:[%s2839_s19 + $0x30] sm:$0xff]  ;;  %vm541_vm0 = vcmask 523264   ;;  %v538_v1 = vld [vmem:[%s2839_s19 + $0x28] sm:$0xff]  ;;  %v537_v2 = vld [vmem:[%s2839_s19 + $0x20] sm:$0xff]  ;;  %v2624_v16 = vmov 64.0  }
  0x41   : > { %v560_v3 = vsel %vm541_vm0, %v539_v0, 0.0  ;;  %v557_v4 = vsel %vm541_vm0, %v538_v1, 0.0  ;;  %v554_v5 = vsel %vm541_vm0, %v537_v2, 0.0  ;;  %v535_v6 = vld [vmem:[%s2839_s19 + $0x10] sm:$0xff]  ;;  %v534_v7 = vld [vmem:[%s2839_s19 + $0x8] sm:$0xff]  ;;  %v533_v8 = vld [vmem:[%s2839_s19] sm:$0xff]  ;;  %2231 = vrcp.f32 %v2624_v16 }
  0x42   : > { %561 = vadd.xlane.f32.xlu2 %v560_v3  ;;  %558 = vadd.xlane.f32.xlu1 %v557_v4  ;;  %v548_v9 = vsel %vm541_vm0, %v535_v6, 0.0  ;;  %v545_v10 = vsel %vm541_vm0, %v534_v7, 0.0  ;;  %v542_v11 = vsel %vm541_vm0, %v533_v8, 0.0  ;;  %v536_v12 = vld [vmem:[%s2839_s19 + $0x18] sm:$0xff]  ;;  %v763_v63 = vld [vmem:[%s3515_s3 + $0x70] sm:$0xff] }
  0x43   : > { %555 = vadd.xlane.f32.xlu0 %v554_v5  ;;  %v540_v13 = vld [vmem:[%s2839_s19 + $0x38] sm:$0xff]  ;;  %v551_v14 = vsel %vm541_vm0, %v536_v12, 0.0  ;;  %2062 = vmatpush.msra.mxu2 %v763_v63  ;;  %v759_v3 = vld [vmem:[%s3515_s3 + $0x50] sm:$0xff]  ;;  %v757_v5 = vld [vmem:[%s3515_s3 + $0x40] sm:$0xff] }
  0x44   : > { %v563_v15 = vsel %vm541_vm0, %v540_v13, 0.0  ;;  %803 = vmatpush.msra.mxu0 %v763_v63  ;;  %v760_v4 = vld [vmem:[%s3515_s3 + $0x58] sm:$0xff] }
  0x47   : > { %v2232_v17 = vpop.eup %2231 }
  0x48   : > { %v567_v18 = vmul.f32 64.0, %v2232_v17  ;;  %vm571_vm1 = vweird.f32 %v2232_v17 }
  0x4a   : > { %549 = vadd.xlane.f32.xlu2 %v548_v9  ;;  %546 = vadd.xlane.f32.xlu1 %v545_v10  ;;  %v568_v19 = vsub.f32 1.0, %v567_v18  ;;  %v753_v9 = vld [vmem:[%s3515_s3 + $0x20] sm:$0xff]  ;;  %v754_v10 = vld [vmem:[%s3515_s3 + $0x28] sm:$0xff] }
  0x4b   : > { %543 = vadd.xlane.f32.xlu0 %v542_v11  ;;  %v751_v11 = vld [vmem:[%s3515_s3 + $0x10] sm:$0xff] }
  0x4c   : > { %v569_v20 = vmul.f32 %v2232_v17, %v568_v19 }
  0x4e   : > { %v570_v21 = vadd.f32 %v2232_v17, %v569_v20 }
  0x50   : > { %v2860_v22 = vsel %vm571_vm1, %v2232_v17, %v570_v21 }
  0x52   : > { %552 = vadd.xlane.f32.xlu1 %v551_v14  ;;  %v750_v14 = vld [vmem:[%s3515_s3 + $0x8] sm:$0xff] }
  0x53   : > { %564 = vadd.xlane.f32.xlu0 %v563_v15 }
  0xb5   : > { %v562_v23 = vpop.xlane.xlu2 %561  ;;  %v559_v24 = vpop.xlane.xlu1 %558 }
  0xb6   : > { %v578_v25 = vmul.f32 %v2860_v22, %v559_v24  ;;  %v556_v26 = vpop.xlane.xlu0 %555  ;;  %v579_v39 = vmul.f32 %v2860_v22, %v562_v23 }
  0xb7   : > { %v577_v27 = vmul.f32 %v2860_v22, %v556_v26 }
  0xb8   : > { %v2864_v28 = vsub.f32 %v538_v1, %v578_v25  ;;  %v2888_v46 = vsub.f32 %v539_v0, %v579_v39  ;;  %v764_v0 = vld [vmem:[%s3515_s3 + $0x78] sm:$0xff]  ;;  %v761_v1 = vld [vmem:[%s3515_s3 + $0x60] sm:$0xff] }
  0xb9   : > { %v2866_v29 = vsub.f32 %v537_v2, %v577_v27  ;;  %2070 = vmatpush.msra.mxu3 %v764_v0  ;;  %v762_v2 = vld [vmem:[%s3515_s3 + $0x68] sm:$0xff]  ;;  %844 = vmatpush.msra.mxu1 %v764_v0 }
  0xba   : > { %v594_v30 = vmul.f32 %v2864_v28, %v2864_v28  ;;  %v595_v55 = vmul.f32 %v2888_v46, %v2888_v46  ;;  %2063 = vmatpush.msra.mxu2 %v761_v1  ;;  %804 = vmatpush.msra.mxu0 %v761_v1  ;;  %v2985_v1 = vld [vmem:[#allocation3] ss:$0 sm:$0xff] }
  0xbb   : > { %v593_v31 = vmul.f32 %v2866_v29, %v2866_v29  ;;  %2071 = vmatpush.msra.mxu3 %v762_v2  ;;  %845 = vmatpush.msra.mxu1 %v762_v2 }
  0xbc   : > { %v612_v32 = vsel %vm541_vm0, %v594_v30, 0.0  ;;  %v615_v58 = vsel %vm541_vm0, %v595_v55, 0.0  ;;  %2064 = vmatpush.msra.mxu2 %v759_v3  ;;  %805 = vmatpush.msra.mxu0 %v759_v3 }
  0xbd   : > { %v609_v33 = vsel %vm541_vm0, %v593_v31, 0.0  ;;  %v550_v34 = vpop.xlane.xlu2 %549  ;;  %613 = vadd.xlane.f32.xlu1 %v612_v32  ;;  %v547_v35 = vpop.xlane.xlu1 %546  ;;  %2072 = vmatpush.msra.mxu3 %v760_v4 }
  0xbe   : > { %610 = vadd.xlane.f32.xlu2 %v609_v33  ;;  %v575_v36 = vmul.f32 %v2860_v22, %v550_v34  ;;  %v574_v37 = vmul.f32 %v2860_v22, %v547_v35  ;;  %v544_v38 = vpop.xlane.xlu0 %543  ;;  %846 = vmatpush.msra.mxu1 %v760_v4 }
  0xbf   : > { %v573_v40 = vmul.f32 %v2860_v22, %v544_v38  ;;  %2065 = vmatpush.msra.mxu2 %v757_v5  ;;  %806 = vmatpush.msra.mxu0 %v757_v5 }
  0xc0   : > { %v2878_v41 = vsub.f32 %v535_v6, %v575_v36  ;;  %v2880_v42 = vsub.f32 %v534_v7, %v574_v37  ;;  %v758_v6 = vld [vmem:[%s3515_s3 + $0x48] sm:$0xff]  ;;  %v755_v7 = vld [vmem:[%s3515_s3 + $0x30] sm:$0xff] }
  0xc1   : > { %v2882_v43 = vsub.f32 %v533_v8, %v573_v40  ;;  %2073 = vmatpush.msra.mxu3 %v758_v6  ;;  %v756_v8 = vld [vmem:[%s3515_s3 + $0x38] sm:$0xff]  ;;  %847 = vmatpush.msra.mxu1 %v758_v6 }
  0xc2   : > { %v591_v44 = vmul.f32 %v2878_v41, %v2878_v41  ;;  %v590_v45 = vmul.f32 %v2880_v42, %v2880_v42  ;;  %2066 = vmatpush.msra.mxu2 %v755_v7  ;;  %807 = vmatpush.msra.mxu0 %v755_v7 }
  0xc3   : > { %v589_v47 = vmul.f32 %v2882_v43, %v2882_v43  ;;  %2074 = vmatpush.msra.mxu3 %v756_v8  ;;  %848 = vmatpush.msra.mxu1 %v756_v8  ;;  %v2996_v8 = vld [vmem:[#allocation6] ss:$0 sm:$0xff] }
  0xc4   : > { %v603_v48 = vsel %vm541_vm0, %v591_v44, 0.0  ;;  %v600_v49 = vsel %vm541_vm0, %v590_v45, 0.0  ;;  %2067 = vmatpush.msra.mxu2 %v753_v9  ;;  %808 = vmatpush.msra.mxu0 %v753_v9 }
  0xc5   : > { %604 = vadd.xlane.f32.xlu1 %v603_v48  ;;  %v597_v50 = vsel %vm541_vm0, %v589_v47, 0.0  ;;  %v553_v51 = vpop.xlane.xlu1 %552  ;;  %2075 = vmatpush.msra.mxu3 %v754_v10 }
  0xc6   : > { %601 = vadd.xlane.f32.xlu2 %v600_v49  ;;  %598 = vadd.xlane.f32.xlu0 %v597_v50  ;;  %v565_v52 = vpop.xlane.xlu0 %564  ;;  %v576_v54 = vmul.f32 %v2860_v22, %v553_v51 }
  0xc7   : > { %v580_v53 = vmul.f32 %v2860_v22, %v565_v52  ;;  %849 = vmatpush.msra.mxu1 %v754_v10  ;;  %2068 = vmatpush.msra.mxu2 %v751_v11 }
  0xc8   : > { %v2901_v57 = vsub.f32 %v536_v12, %v576_v54  ;;  %v752_v12 = vld [vmem:[%s3515_s3 + $0x18] sm:$0xff]  ;;  %809 = vmatpush.msra.mxu0 %v751_v11 }
  0xc9   : > { %v2899_v56 = vsub.f32 %v540_v13, %v580_v53  ;;  %2076 = vmatpush.msra.mxu3 %v752_v12  ;;  %v749_v13 = vld [vmem:[%s3515_s3] sm:$0xff]  ;;  %850 = vmatpush.msra.mxu1 %v752_v12 }
  0xca   : > { %v592_v61 = vmul.f32 %v2901_v57, %v2901_v57  ;;  %2069 = vmatpush.msra.mxu2 %v749_v13  ;;  %810 = vmatpush.msra.mxu0 %v749_v13 }
  0xcb   : > { %v596_v59 = vmul.f32 %v2899_v56, %v2899_v56  ;;  %2077 = vmatpush.msra.mxu3 %v750_v14  ;;  %851 = vmatpush.msra.mxu1 %v750_v14 }
  0xcc   : > { %v606_v62 = vsel %vm541_vm0, %v592_v61, 0.0 }
  0xcd   : > { %v618_v60 = vsel %vm541_vm0, %v596_v59, 0.0 }
  0xce   : > { %616 = vadd.xlane.f32.xlu0 %v615_v58  ;;  %619 = vadd.xlane.f32.xlu2 %v618_v60 }
  0xd6   : > { %607 = vadd.xlane.f32.xlu0 %v606_v62 }
 0x130   : > { %v614_v15 = vpop.xlane.xlu1 %613 }
 0x131   : > { %v611_v16 = vpop.xlane.xlu2 %610  ;;  %v626_v17 = vmul.f32 %v614_v15, %v2860_v22 }
 0x132   : > { %v625_v18 = vmul.f32 %v611_v16, %v2860_v22 }
 0x133   : > { %v634_v19 = vadd.f32 1e-05, %v626_v17 }
 0x134   : > { %v633_v20 = vadd.f32 1e-05, %v625_v18 }
 0x135   : > { %2233 = vrsqrt.f32 %v634_v19  ;;  %vm693_vm4 = vweird.f32 %v634_v19 }
 0x136   : > { %2235 = vrsqrt.f32 %v633_v20  ;;  %vm683_vm3 = vweird.f32 %v633_v20 }
 0x138   : > { %v605_v21 = vpop.xlane.xlu1 %604 }
 0x139   : > { %v602_v23 = vpop.xlane.xlu2 %601  ;;  %v623_v24 = vmul.f32 %v605_v21, %v2860_v22  ;;  %v599_v25 = vpop.xlane.xlu0 %598 }
 0x13a   : > { %v622_v26 = vmul.f32 %v602_v23, %v2860_v22  ;;  %v621_v27 = vmul.f32 %v599_v25, %v2860_v22 }
 0x13b   : > { %v2234_v30 = vpop.eup %2233  ;;  %v2963_v31 = vadd.f32 1e-05, %v623_v24 }
 0x13c   : > { %v2236_v32 = vpop.eup %2235  ;;  %v688_v33 = vmul.f32 %v2234_v30, %v634_v19  ;;  %v2965_v34 = vadd.f32 1e-05, %v622_v26  ;;  %v629_v35 = vadd.f32 1e-05, %v621_v27  ;;  %vm694_vm5 = vweird.f32 %v2234_v30 }
 0x13d   : > { %v678_v36 = vmul.f32 %v2236_v32, %v633_v20  ;;  %2237 = vrsqrt.f32 %v2963_v31  ;;  %vm684_vm2 = vweird.f32 %v2236_v32  ;;  %vm2988_vm7 = vmor %vm693_vm4, %vm694_vm5  ;;  %vm663_vm14 = vweird.f32 %v2963_v31 }
 0x13e   : > { %v689_v37 = vmul.f32 %v2234_v30, %v688_v33  ;;  %2239 = vrsqrt.f32 %v2965_v34  ;;  %vm685_vm6 = vmor %vm683_vm3, %vm684_vm2  ;;  %vm653_vm9 = vweird.f32 %v2965_v34  ;;  %vm643_vm11 = vweird.f32 %v629_v35 }
 0x13f   : > { %v679_v38 = vmul.f32 %v2236_v32, %v678_v36  ;;  %2241 = vrsqrt.f32 %v629_v35 }
 0x140   : > { %v690_v39 = vmul.f32 0.5, %v689_v37 }
 0x141   : > { %v680_v40 = vmul.f32 0.5, %v679_v38  ;;  %v620_v44 = vpop.xlane.xlu2 %619  ;;  %v617_v45 = vpop.xlane.xlu0 %616 }
 0x142   : > { %v691_v47 = vsub.f32 1.5, %v690_v39  ;;  %v628_v48 = vmul.f32 %v620_v44, %v2860_v22  ;;  %v627_v49 = vmul.f32 %v617_v45, %v2860_v22 }
 0x143   : > { %v2971_v50 = vpop.eup %2237  ;;  %v681_v51 = vsub.f32 1.5, %v680_v40 }
 0x144   : > { %v2973_v52 = vpop.eup %2239  ;;  %v2975_v53 = vadd.f32 1e-05, %v628_v48  ;;  %v692_v58 = vmul.f32 %v2234_v30, %v691_v47  ;;  %v2979_v60 = vadd.f32 1e-05, %v627_v49  ;;  %v658_v61 = vmul.f32 %v2971_v50, %v2963_v31 }
 0x145   : > { %v2242_v54 = vpop.eup %2241  ;;  %v682_v55 = vmul.f32 %v2236_v32, %v681_v51  ;;  %v648_v59 = vmul.f32 %v2973_v52, %v2965_v34  ;;  %vm654_vm10 = vweird.f32 %v2973_v52  ;;  %vm664_vm15 = vweird.f32 %v2971_v50 }
 0x146   : > { %v638_v62 = vmul.f32 %v2242_v54, %v629_v35  ;;  %2243 = vrsqrt.f32 %v2975_v53  ;;  %v696_v4 = vsel %vm2988_vm7, %v2234_v30, %v692_v58  ;;  %v659_v9 = vmul.f32 %v2971_v50, %v658_v61  ;;  %vm3022_vm13 = vmor %vm653_vm9, %vm654_vm10 }
 0x147   : > { %v686_v63 = vsel %vm685_vm6, %v2236_v32, %v682_v55  ;;  %v649_v0 = vmul.f32 %v2973_v52, %v648_v59  ;;  %2245 = vrsqrt.f32 %v2979_v60  ;;  %vm644_vm8 = vweird.f32 %v2242_v54  ;;  %vm3039_vm3 = vmor %vm663_vm14, %vm664_vm15 }
 0x148   : > { %v639_v3 = vmul.f32 %v2242_v54, %v638_v62  ;;  %v721_v7 = vmul.f32 %v686_v63, %v2866_v29  ;;  %v722_v16 = vmul.f32 %v696_v4, %v2864_v28  ;;  %v660_v19 = vmul.f32 0.5, %v659_v9  ;;  %vm645_vm12 = vmor %vm643_vm11, %vm644_vm8 }
 0x149   : > { %v650_v5 = vmul.f32 0.5, %v649_v0  ;;  %v608_v6 = vpop.xlane.xlu0 %607  ;;  %vm713_vm2 = vweird.f32 %v2975_v53  ;;  %vm703_vm5 = vweird.f32 %v2979_v60 }
 0x14a   : > { %v640_v10 = vmul.f32 0.5, %v639_v3  ;;  %v624_v11 = vmul.f32 %v608_v6, %v2860_v22  ;;  %v733_v13 = vmul.f32 %v2985_v1, %v721_v7  ;;  %v734_v25 = vmul.f32 %v2985_v1, %v722_v16  ;;  %v765_v7 = vld [vmem:[#allocation8] sm:$0x3] }
 0x14b   : > { %v651_v12 = vsub.f32 1.5, %v650_v5  ;;  %v661_v33 = vsub.f32 1.5, %v660_v19  ;;  %v768_v9 = vperm.slane %v765_v7, 1 }
 0x14c   : > { %v641_v14 = vsub.f32 1.5, %v640_v10  ;;  %v3001_v15 = vadd.f32 1e-05, %v624_v11  ;;  %v3004_v17 = vpop.eup %2243  ;;  %v745_v29 = vadd.f32 %v2996_v8, %v733_v13  ;;  %v746_v38 = vadd.f32 %v2996_v8, %v734_v25 }
 0x14d   : > { %v2246_v18 = vpop.eup %2245  ;;  %v652_v22 = vmul.f32 %v2973_v52, %v651_v12  ;;  %v708_v21 = vmul.f32 %v3004_v17, %v2975_v53  ;;  %v662_v45 = vmul.f32 %v2971_v50, %v661_v33  ;;  %vm714_vm4 = vweird.f32 %v3004_v17 }
 0x14e   : > { %v642_v20 = vmul.f32 %v2242_v54, %v641_v14  ;;  %v698_v28 = vmul.f32 %v2246_v18, %v2979_v60  ;;  %2247 = vrsqrt.f32 %v3001_v15  ;;  %1985 = vmatmul.msk.f32.vlgmr.msra.gmra.mxu2 %vm541_vm0, %v745_v29  ;;  %1993 = vmatmul.msk.f32.vlgmr.msra.gmra.mxu3 %vm541_vm0, %v745_v29  ;;  %vm704_vm1 = vweird.f32 %v2246_v18  ;;  %vm715_vm7 = vmor %vm713_vm2, %vm714_vm4 }
 0x14f   : > { %v709_v24 = vmul.f32 %v3004_v17, %v708_v21  ;;  %v656_v32 = vsel %vm3022_vm13, %v2973_v52, %v652_v22  ;;  %vm705_vm6 = vmor %vm703_vm5, %vm704_vm1  ;;  %vm673_vm8 = vweird.f32 %v3001_v15 }
 0x150   : > { %v646_v23 = vsel %vm645_vm12, %v2242_v54, %v642_v20  ;;  %v699_v27 = vmul.f32 %v2246_v18, %v698_v28  ;;  %v718_v44 = vmul.f32 %v656_v32, %v2880_v42  ;;  %v666_v54 = vsel %vm3039_vm3, %v2971_v50, %v662_v45 }
 0x151   : > { %v717_v30 = vmul.f32 %v646_v23, %v2882_v43  ;;  %v710_v35 = vmul.f32 0.5, %v709_v24  ;;  %v719_v63 = vmul.f32 %v666_v54, %v2878_v41 }
 0x152   : > { %v700_v36 = vmul.f32 0.5, %v699_v27  ;;  %v730_v52 = vmul.f32 %v2985_v1, %v718_v44 }
 0x153   : > { %v729_v37 = vmul.f32 %v2985_v1, %v717_v30  ;;  %v711_v34 = vsub.f32 1.5, %v710_v35 }
 0x154   : > { %v2248_v39 = vpop.eup %2247  ;;  %v701_v40 = vsub.f32 1.5, %v700_v36  ;;  %v742_v62 = vadd.f32 %v2996_v8, %v730_v52 }
 0x155   : > { %v741_v43 = vadd.f32 %v2996_v8, %v729_v37  ;;  %v668_v47 = vmul.f32 %v2248_v39, %v3001_v15  ;;  %v712_v48 = vmul.f32 %v3004_v17, %v711_v34  ;;  %vm674_vm9 = vweird.f32 %v2248_v39 }
 0x156   : > { %v702_v49 = vmul.f32 %v2246_v18, %v701_v40  ;;  %1986 = vmatmul.msk.f32.gmra.mxu2 %vm541_vm0, %v746_v38  ;;  %1994 = vmatmul.msk.f32.gmra.mxu3 %vm541_vm0, %v746_v38  ;;  %vm675_vm10 = vmor %vm673_vm8, %vm674_vm9 }
 0x157   : > { %1981 = vmatmul.msk.f32.vlgmr.msra.gmra.mxu0 %vm541_vm0, %v741_v43  ;;  %v669_v42 = vmul.f32 %v2248_v39, %v668_v47  ;;  %1989 = vmatmul.msk.f32.vlgmr.msra.gmra.mxu1 %vm541_vm0, %v741_v43  ;;  %v716_v59 = vsel %vm715_vm7, %v3004_v17, %v712_v48 }
 0x158   : > { %v706_v51 = vsel %vm705_vm6, %v2246_v18, %v702_v49  ;;  %v724_v53 = vmul.f32 %v716_v59, %v2899_v56 }
 0x159   : > { %v670_v55 = vmul.f32 0.5, %v669_v42  ;;  %v723_v58 = vmul.f32 %v706_v51, %v2888_v46  ;;  %v731_v46 = vmul.f32 %v2985_v1, %v719_v63 }
 0x15a   : > { %v736_v41 = vmul.f32 %v2985_v1, %v724_v53 }
 0x15b   : > { %v671_v60 = vsub.f32 1.5, %v670_v55  ;;  %v735_v61 = vmul.f32 %v2985_v1, %v723_v58  ;;  %v743_v3 = vadd.f32 %v2996_v8, %v731_v46 }
 0x15c   : > { %v748_v56 = vadd.f32 %v2996_v8, %v736_v41 }
 0x15d   : > { %v672_v0 = vmul.f32 %v2248_v39, %v671_v60  ;;  %v747_v50 = vadd.f32 %v2996_v8, %v735_v61 }
 0x15f   : > { %1982 = vmatmul.msk.f32.gmra.mxu0 %vm541_vm0, %v742_v62  ;;  %1987 = vmatmul.msk.f32.gmra.mxu2 %vm541_vm0, %v747_v50  ;;  %v676_v2 = vsel %vm675_vm10, %v2248_v39, %v672_v0 }
 0x160   : > { %1990 = vmatmul.msk.f32.gmra.mxu1 %vm541_vm0, %v742_v62  ;;  %1995 = vmatmul.msk.f32.gmra.mxu3 %vm541_vm0, %v747_v50  ;;  %v720_v4 = vmul.f32 %v676_v2, %v2901_v57  ;;  %v767_v57 = vperm.slane %v765_v7, 0 }
 0x162   : > { %v732_v5 = vmul.f32 %v2985_v1, %v720_v4 }
 0x164   : > { %v744_v6 = vadd.f32 %v2996_v8, %v732_v5 }
 0x167   : > { %1983 = vmatmul.msk.f32.gmra.mxu0 %vm541_vm0, %v743_v3  ;;  %1988 = vmatmul.msk.f32.gmra.mxu2 %vm541_vm0, %v748_v56 }
 0x168   : > { %1991 = vmatmul.msk.f32.gmra.mxu1 %vm541_vm0, %v743_v3  ;;  %1996 = vmatmul.msk.f32.gmra.mxu3 %vm541_vm0, %v748_v56 }
 0x16f   : > { %1984 = vmatmul.msk.f32.gmra.mxu0 %vm541_vm0, %v744_v6 }
 0x170   : > { %1992 = vmatmul.msk.f32.gmra.mxu1 %vm541_vm0, %v744_v6 }
 0x1d1   : > { %v824_v10 = vpop.f32.mrf.mxu2  ;;  %v865_v11 = vpop.f32.mrf.mxu3 }
 0x1d2   : > { %v825_v12 = vadd.f32 %v824_v10, %v767_v57  ;;  %v866_v13 = vadd.f32 %v865_v11, %v768_v9 }
 0x1d4   : > { %v812_v14 = vpop.f32.mrf.mxu0  ;;  %885 = vst [vmem:[#allocation2 + $0x40] sm:$0xff] %v825_v12  ;;  %v853_v16 = vpop.f32.mrf.mxu1 }
 0x1d5   : > { %v813_v15 = vadd.f32 %v812_v14, %v767_v57  ;;  %886 = vst.msk [vmem:[#allocation2 + $0x48] sm:$0xff] %vm541_vm0, %v866_v13  ;;  %v854_v1 = vadd.f32 %v853_v16, %v768_v9 }
 0x1d7   : > { %877 = vst [vmem:[#allocation2] sm:$0xff] %v813_v15 }
 0x1d8   : > { %878 = vst.msk [vmem:[#allocation2 + $0x8] sm:$0xff] %vm541_vm0, %v854_v1 }
 0x1d9   : > { %v827_v8 = vpop.f32.mrf.mxu2  ;;  %v868_v29 = vpop.f32.mrf.mxu3 }
 0x1da   : > { %v828_v17 = vadd.f32 %v827_v8, %v767_v57  ;;  %v869_v18 = vadd.f32 %v868_v29, %v768_v9 }
 0x1dc   : > { %v815_v22 = vpop.f32.mrf.mxu0  ;;  %887 = vst [vmem:[#allocation2 + $0x50] sm:$0xff] %v828_v17 }
 0x1dd   : > { %v816_v19 = vadd.f32 %v815_v22, %v767_v57  ;;  %v856_v20 = vpop.f32.mrf.mxu1  ;;  %888 = vst.msk [vmem:[#allocation2 + $0x58] sm:$0xff] %vm541_vm0, %v869_v18 }
 0x1de   : > { %v857_v21 = vadd.f32 %v856_v20, %v768_v9 }
 0x1df   : > { %879 = vst [vmem:[#allocation2 + $0x10] sm:$0xff] %v816_v19 }
 0x1e0   : > { %880 = vst.msk [vmem:[#allocation2 + $0x18] sm:$0xff] %vm541_vm0, %v857_v21 }
 0x1e2   : > { %v830_v28 = vpop.f32.mrf.mxu2 }
 0x1e3   : > { %v831_v23 = vadd.f32 %v830_v28, %v767_v57  ;;  %v871_v24 = vpop.f32.mrf.mxu3 }
 0x1e4   : > { %v818_v25 = vpop.f32.mrf.mxu0  ;;  %v872_v26 = vadd.f32 %v871_v24, %v768_v9 }
 0x1e5   : > { %v819_v27 = vadd.f32 %v818_v25, %v767_v57  ;;  %v859_v30 = vpop.f32.mrf.mxu1  ;;  %889 = vst [vmem:[#allocation2 + $0x60] sm:$0xff] %v831_v23 }
 0x1e6   : > { %v860_v32 = vadd.f32 %v859_v30, %v768_v9  ;;  %890 = vst.msk [vmem:[#allocation2 + $0x68] sm:$0xff] %vm541_vm0, %v872_v26 }
 0x1e7   : > { %881 = vst [vmem:[#allocation2 + $0x20] sm:$0xff] %v819_v27 }
 0x1e8   : > { %882 = vst.msk [vmem:[#allocation2 + $0x28] sm:$0xff] %vm541_vm0, %v860_v32 }
 0x1ea   : > { %v833_v33 = vpop.f32.mrf.mxu2 }
 0x1eb   : > { %v834_v35 = vadd.f32 %v833_v33, %v767_v57  ;;  %v874_v36 = vpop.f32.mrf.mxu3 }
 0x1ec   : > { %v821_v37 = vpop.f32.mrf.mxu0  ;;  %v875_v34 = vadd.f32 %v874_v36, %v768_v9 }
 0x1ed   : > { %v822_v38 = vadd.f32 %v821_v37, %v767_v57  ;;  %v862_v39 = vpop.f32.mrf.mxu1  ;;  %891 = vst [vmem:[#allocation2 + $0x70] sm:$0xff] %v834_v35 }
 0x1ee   : > { %v863_v40 = vadd.f32 %v862_v39, %v768_v9  ;;  %892 = vst.msk [vmem:[#allocation2 + $0x78] sm:$0xff] %vm541_vm0, %v875_v34 }
 0x1ef   : > { %883 = vst [vmem:[#allocation2 + $0x30] sm:$0xff] %v822_v38 }
 0x1f0   : > { %884 = vst.msk [vmem:[#allocation2 + $0x38] sm:$0xff] %vm541_vm0, %v863_v40 }
 0x1f1 PF: > { %v919_v44 = vld [vmem:[#allocation2 + $0x50] sm:$0xff]  ;;  %s2625_s2 = smov 64   ;;  %v920_v47 = vld [vmem:[#allocation2 + $0x60] sm:$0xff]  ;;  %s2626_s24 = smov 48   ;;  %vm954_vm0 = vcmask 130048   ;;  %v928_v9 = vld [vmem:[#allocation2 + $0x68] sm:$0xff]  ;;  %v897_v26 = vlaneseq }
 0x1f2   : > { %948 = vrot.lane.b32.xlu1 %v919_v44, %s2625_s2  ;;  %v918_v31 = vld [vmem:[#allocation2 + $0x40] sm:$0xff]  ;;  %v915_v49 = vld [vmem:[#allocation2 + $0x10] sm:$0xff]  ;;  %s2627_s20 = smov 32   ;;  %s2628_s27 = smov 16   ;;  %v3145_v10 = vld [vmem:[#allocation2 + $0x58] sm:$0xff]  ;;  %vm1002_vm12 = vcmask 523264  }
 0x1f3   : > { %v916_v48 = vld [vmem:[#allocation2 + $0x20] sm:$0xff]  ;;  %s3102_s15 = sshll.u32 %s2599_s28, 4  ;;  %s2629_s17 = smov 112   ;;  %v3147_v11 = vld [vmem:[#allocation2 + $0x48] sm:$0xff]  ;;  %v923_v16 = vld [vmem:[#allocation2 + $0x18] sm:$0xff]  ;;  %v898_v27 = vshrl.u32 %v897_v26, 7 }
 0x1f4   : > { %v921_v43 = vld [vmem:[#allocation2 + $0x70] sm:$0xff]  ;;  %v914_v42 = vld [vmem:[#allocation2] sm:$0xff]  ;;  %s907_s18 = sshra.s32 %s3102_s15, 3  ;;  %s2630_s13 = smov 96   ;;  %v924_v15 = vld [vmem:[#allocation2 + $0x28] sm:$0xff]  ;;  %v900_v30 = vstv %s3102_s15  ;;  %v3170_v33 = vand.u32 127, %v897_v26 }
 0x1f5   : > { %952 = vrot.lane.b32.xlu0 %v921_v43, %s2625_s2  ;;  %s2061_s22 = sshll.u32 %s907_s18, 4  ;;  %s2631_s30 = smov 80   ;;  %v929_v57 = vld [vmem:[#allocation2 + $0x78] sm:$0xff]  ;;  %v922_v1 = vld [vmem:[#allocation2 + $0x8] sm:$0xff]  ;;  %v3168_v32 = vadd.s32 %v900_v30, %v898_v27  ;;  %v899_v35 = vadd.s32 8, %v898_v27  ;;  %vm1508_vm14 = vcmask 261120  }
 0x1f6   : > { %v917_v45 = vld [vmem:[#allocation2 + $0x30] sm:$0xff]  ;;  %s911_s21 = scalar_lea.vmem [#allocation2], %s2061_s22  ;;  %1037 = vmatpush.msra.mxu1 %v929_v57  ;;  %v3182_v39 = vpack.i.bf16 %v928_v9, %v929_v57  ;;  %vm1511_vm15 = vcmask 392192   ;;  %s894_s25 = scalar_lea.vmem %s2839_s19, %s3102_s15 }
 0x1f7   : > { %944 = vrot.lane.b32.xlu2 %v917_v45, %s2625_s2  ;;  %v912_v51 = vld [vmem:[%s911_s21] sm:$0xff]  ;;  %v3115_v52 = vld [vmem:[%s911_s21 + $0x10] sm:$0xff]  ;;  %v925_v12 = vld [vmem:[#allocation2 + $0x38] sm:$0xff]  ;;  %vm905_vm11 = vcmp.gt.s32.totalorder %v3170_v33, %v3168_v32  ;;  %v3178_v38 = vadd.s32 %v900_v30, %v899_v35  ;;  %s1815_s18 = scalar_lea.sflag [#allocation5], %s520_s5 }
 0x1f8   : > { %1038 = vmatpush.msra.mxu1 %v928_v9 }
 0x1f9   : > { %vm906_vm13 = vcmp.gt.s32.totalorder %v3170_v33, %v3178_v38 }
 0x1fa   : > { %946 = vrot.lane.b32.xlu1 %v918_v31, %s2625_s2  ;;  %1039 = vmatpush.msra.mxu1 %v3145_v10 }
 0x1fc   : > { %1040 = vmatpush.msra.mxu1 %v3147_v11 }
 0x1fd   : > { %950 = vrot.lane.b32.xlu0 %v920_v47, %s2625_s2 }
 0x1fe   : > { %1041 = vmatpush.msra.mxu1 %v925_v12 }
 0x1ff   : > { %942 = vrot.lane.b32.xlu2 %v916_v48, %s2625_s2 }
 0x200   : > { %1042 = vmatpush.msra.mxu1 %v924_v15 }
 0x202   : > { %938 = vrot.lane.b32.xlu1 %v914_v42, %s2625_s2  ;;  %1043 = vmatpush.msra.mxu1 %v923_v16 }
 0x204   : > { %1044 = vmatpush.msra.mxu1 %v922_v1 }
 0x205   : > { %940 = vrot.lane.b32.xlu0 %v915_v49, %s2625_s2 }
 0x207   : > { %1072 = vrot.lane.b32.xlu2 %v921_v43, %s2626_s24 }
 0x20a   : > { %1068 = vrot.lane.b32.xlu1 %v919_v44, %s2626_s24 }
 0x20d   : > { %1070 = vrot.lane.b32.xlu0 %v920_v47, %s2626_s24 }
 0x20f   : > { %1066 = vrot.lane.b32.xlu2 %v918_v31, %s2626_s24 }
 0x212   : > { %1062 = vrot.lane.b32.xlu1 %v916_v48, %s2626_s24 }
 0x215   : > { %1064 = vrot.lane.b32.xlu0 %v917_v45, %s2626_s24 }
 0x217   : > { %1220 = vrot.lane.b32.xlu2 %v921_v43, %s2627_s20 }
 0x21a   : > { %1060 = vrot.lane.b32.xlu1 %v915_v49, %s2626_s24 }
 0x21d   : > { %1360 = vrot.lane.b32.xlu0 %v921_v43, %s2628_s27 }
 0x21f   : > { %1212 = vrot.lane.b32.xlu2 %v917_v45, %s2627_s20 }
 0x222   : > { %1358 = vrot.lane.b32.xlu1 %v920_v47, %s2628_s27 }
 0x225   : > { %1218 = vrot.lane.b32.xlu0 %v920_v47, %s2627_s20  ;;  %v2254_v47 = vpack.i.bf16 %v3147_v11, %v3145_v10 }
 0x227   : > { %1350 = vrot.lane.b32.xlu2 %v916_v48, %s2628_s27 }
 0x22a   : > { %1216 = vrot.lane.b32.xlu1 %v919_v44, %s2627_s20 }
 0x22d   : > { %1058 = vrot.lane.b32.xlu0 %v914_v42, %s2626_s24 }
 0x22f   : > { %1348 = vrot.lane.b32.xlu2 %v915_v49, %s2628_s27 }
 0x232   : > { %1356 = vrot.lane.b32.xlu1 %v919_v44, %s2628_s27 }
 0x235   : > { %1054 = vrot.lane.b32.xlu0 %v912_v51, %s2629_s17 }
 0x237   : > { %1202 = vrot.lane.b32.xlu2 %v912_v51, %s2630_s13 }
 0x23a   : > { %1214 = vrot.lane.b32.xlu1 %v918_v31, %s2627_s20 }
 0x23d   : > { %1206 = vrot.lane.b32.xlu0 %v914_v42, %s2627_s20 }
 0x242   : > { %1354 = vrot.lane.b32.xlu1 %v918_v31, %s2628_s27  ;;  %v3197_v31 = vpack.i.bf16 %v922_v1, %v923_v16 }
 0x24a   : > { %1056 = vrot.lane.b32.xlu1 %v3115_v52, %s2629_s17 }
 0x251   : > { %v945_v54 = vpop.permute.xlu2 %944 }
 0x252   : > { %1352 = vrot.lane.b32.xlu1 %v917_v45, %s2628_s27  ;;  %v2259_v45 = vpack.i.bf16 %v924_v15, %v925_v12 }
 0x259   : > { %v943_v59 = vpop.permute.xlu2 %942 }
 0x25a   : > { %1210 = vrot.lane.b32.xlu1 %v916_v48, %s2627_s20 }
 0x261   : > { %v1073_v62 = vpop.permute.xlu2 %1072 }
 0x262   : > { %1208 = vrot.lane.b32.xlu1 %v915_v49, %s2627_s20  ;;  %2012 = vmatpush.xpose.msk.msra.mxu2 %vm954_vm0, %v1073_v62 }
 0x264   : > { %v949_v58 = vpop.permute.xlu1 %948 }
 0x267   : > { %v953_v55 = vpop.permute.xlu0 %952 }
 0x268   : > { %2000 = vmatpush.xpose.msk.msra.mxu0 %vm954_vm0, %v953_v55 }
 0x269   : > { %v1067_v46 = vpop.permute.xlu2 %1066 }
 0x26a   : > { %1346 = vrot.lane.b32.xlu1 %v914_v42, %s2628_s27 }
 0x26c   : > { %v947_v61 = vpop.permute.xlu1 %946 }
 0x26f   : > { %v951_v60 = vpop.permute.xlu0 %950 }
 0x270   : > { %2001 = vmatpush.xpose.msk.msra.mxu0 %vm954_vm0, %v951_v60 }
 0x271   : > { %v1221_v17 = vpop.permute.xlu2 %1220 }
 0x272   : > { %1342 = vrot.lane.b32.xlu1 %v912_v51, %s2631_s30  ;;  %2024 = vmatpush.xpose.msk.msrb.mxu1 %vm954_vm0, %v1221_v17 }
 0x274   : > { %2002 = vmatpush.xpose.msk.msra.mxu0 %vm954_vm0, %v949_v58  ;;  %v939_v0 = vpop.permute.xlu1 %938 }
 0x277   : > { %v941_v63 = vpop.permute.xlu0 %940 }
 0x278   : > { %2003 = vmatpush.xpose.msk.msra.mxu0 %vm954_vm0, %v947_v61 }
 0x279   : > { %v1213_v22 = vpop.permute.xlu2 %1212 }
 0x27a   : > { %2250 = vrot.lane.b32.xlu1 %v3182_v39, %s2629_s17 }
 0x27c   : > { %2004 = vmatpush.xpose.msk.msra.mxu0 %vm954_vm0, %v945_v54  ;;  %v1069_v50 = vpop.permute.xlu1 %1068 }
 0x27f   : > { %v1071_v53 = vpop.permute.xlu0 %1070 }
 0x280   : > { %2005 = vmatpush.xpose.msk.msra.mxu0 %vm954_vm0, %v943_v59  ;;  %2013 = vmatpush.xpose.msk.msra.mxu2 %vm954_vm0, %v1071_v53 }
 0x281   : > { %v1351_v20 = vpop.permute.xlu2 %1350 }
 0x282   : > { %2260 = vrot.lane.b32.xlu1 %v2259_v45, %s2629_s17 }
 0x284   : > { %2006 = vmatpush.xpose.msk.msra.mxu0 %vm954_vm0, %v941_v63  ;;  %2014 = vmatpush.xpose.msk.msra.mxu2 %vm954_vm0, %v1069_v50  ;;  %v1063_v2 = vpop.permute.xlu1 %1062 }
 0x287   : > { %v1065_v41 = vpop.permute.xlu0 %1064 }
 0x288   : > { %2007 = vmatpush.xpose.msk.msra.mxu0 %vm954_vm0, %v939_v0  ;;  %2015 = vmatpush.xpose.msk.msra.mxu2 %vm954_vm0, %v1067_v46 }
 0x289   : > { %v1349_v24 = vpop.permute.xlu2 %1348 }
 0x28a   : > { %2265 = vrot.lane.b32.xlu1 %v3197_v31, %s2629_s17 }
 0x28b   : > { %2008 = vmatmul.msk.f32.vlgmr.msra.gmra.mxu0 %vm954_vm0, %v912_v51 }
 0x28c   : > { %2016 = vmatpush.xpose.msk.msra.mxu2 %vm954_vm0, %v1065_v41  ;;  %v1061_v3 = vpop.permute.xlu1 %1060 }
 0x28f   : > { %v1361_v4 = vpop.permute.xlu0 %1360 }
 0x290   : > { %2017 = vmatpush.xpose.msk.msra.mxu2 %vm954_vm0, %v1063_v2  ;;  %2036 = vmatpush.xpose.msk.msrb.mxu0 %vm954_vm0, %v1361_v4 }
 0x291   : > { %v1203_v58 = vpop.permute.xlu2 %1202 }
 0x292   : > { %2270 = vrot.lane.b32.xlu1 %v3182_v39, %s2630_s13 }
 0x293   : > { %2009 = vmatmul.msk.f32.gmra.mxu0 %vm954_vm0, %v3115_v52 }
 0x294   : > { %2018 = vmatpush.xpose.msk.msra.mxu2 %vm954_vm0, %v1061_v3  ;;  %v1359_v56 = vpop.permute.xlu1 %1358 }
 0x295   : > { %2037 = vmatpush.xpose.msk.msrb.mxu0 %vm954_vm0, %v1359_v56 }
 0x297   : > { %v1219_v5 = vpop.permute.xlu0 %1218 }
 0x298   : > { %2025 = vmatpush.xpose.msk.msrb.mxu1 %vm954_vm0, %v1219_v5 }
 0x29a   : > { %2275 = vrot.lane.b32.xlu1 %v3182_v39, %s2631_s30 }
 0x29c   : > { %v1217_v6 = vpop.permute.xlu1 %1216 }
 0x29d   : > { %2026 = vmatpush.xpose.msk.msrb.mxu1 %vm954_vm0, %v1217_v6 }
 0x29f   : > { %v1059_v7 = vpop.permute.xlu0 %1058 }
 0x2a0   : > { %2019 = vmatpush.xpose.msk.msra.mxu2 %vm954_vm0, %v1059_v7 }
 0x2a4   : > { %v1357_v13 = vpop.permute.xlu1 %1356 }
 0x2a5   : > { %2038 = vmatpush.xpose.msk.msrb.mxu0 %vm954_vm0, %v1357_v13 }
 0x2a7   : > { %v1055_v14 = vpop.permute.xlu0 %1054 }
 0x2a8   : > { %2020 = vmatmul.msk.f32.vlgmr.msra.gmra.mxu2 %vm954_vm0, %v1055_v14 }
 0x2ac   : > { %v1215_v8 = vpop.permute.xlu1 %1214 }
 0x2ad   : > { %2027 = vmatpush.xpose.msk.msrb.mxu1 %vm954_vm0, %v1215_v8 }
 0x2af   : > { %v1207_v48 = vpop.permute.xlu0 %1206 }
 0x2b1   : > { %2028 = vmatpush.xpose.msk.msrb.mxu1 %vm954_vm0, %v1213_v22 }
 0x2b4   : > { %v1355_v29 = vpop.permute.xlu1 %1354 }
 0x2b5   : > { %2039 = vmatpush.xpose.msk.msrb.mxu0 %vm954_vm0, %v1355_v29 }
 0x2bc   : > { %v1057_v18 = vpop.permute.xlu1 %1056 }
 0x2bd   : > { %2021 = vmatmul.msk.f32.gmra.mxu2 %vm954_vm0, %v1057_v18 }
 0x2c4   : > { %v1353_v19 = vpop.permute.xlu1 %1352 }
 0x2c5   : > { %2040 = vmatpush.xpose.msk.msrb.mxu0 %vm954_vm0, %v1353_v19 }
 0x2c9   : > { %2041 = vmatpush.xpose.msk.msrb.mxu0 %vm954_vm0, %v1351_v20 }
 0x2cc   : > { %v1211_v21 = vpop.permute.xlu1 %1210 }
 0x2cd   : > { %2029 = vmatpush.xpose.msk.msrb.mxu1 %vm954_vm0, %v1211_v21  ;;  %2042 = vmatpush.xpose.msk.msrb.mxu0 %vm954_vm0, %v1349_v24 }
 0x2d4   : > { %v1209_v28 = vpop.permute.xlu1 %1208 }
 0x2d5   : > { %2030 = vmatpush.xpose.msk.msrb.mxu1 %vm954_vm0, %v1209_v28 }
 0x2d9   : > { %2031 = vmatpush.xpose.msk.msrb.mxu1 %vm954_vm0, %v1207_v48 }
 0x2dc   : > { %v1347_v23 = vpop.permute.xlu1 %1346 }
 0x2dd   : > { %2043 = vmatpush.xpose.msk.msrb.mxu0 %vm954_vm0, %v1347_v23 }
 0x2e4   : > { %v1343_v25 = vpop.permute.xlu1 %1342 }
 0x2e5   : > { %2044 = vmatmul.msk.f32.vlgmr.msrb.gmra.mxu0 %vm954_vm0, %v1343_v25 }
 0x2ec   : > { %v2251_v62 = vpop.permute.xlu1 %2250 }
 0x2ed   : > { %v2252_v63 = vunpack.i.l.bf16 %v2251_v62  ;;  %v2253_v0 = vunpack.i.h.bf16 %v2251_v62 }
 0x2ef   : > { %1185 = vmatpush.msra.mxu3 %v2252_v63 }
 0x2f1   : > { %1186 = vmatpush.msra.mxu3 %v2253_v0 }
 0x2f4   : > { %v2261_v6 = vpop.permute.xlu1 %2260 }
 0x2f5   : > { %v2262_v11 = vunpack.i.l.bf16 %v2261_v6  ;;  %v2263_v13 = vunpack.i.h.bf16 %v2261_v6 }
 0x2fc   : > { %v2266_v12 = vpop.permute.xlu1 %2265 }
 0x2fd   : > { %v2267_v14 = vunpack.i.l.bf16 %v2266_v12  ;;  %v2268_v15 = vunpack.i.h.bf16 %v2266_v12 }
 0x304   : > { %v2271_v24 = vpop.permute.xlu1 %2270 }
 0x305   : > { %v2272_v25 = vunpack.i.l.bf16 %v2271_v24  ;;  %v2273_v26 = vunpack.i.h.bf16 %v2271_v24 }
 0x308   : > { %v994_v36 = vpop.f32.mrf.mxu0 }
 0x309   : > { %v1000_v37 = vsel %vm905_vm11, -inf, %v994_v36 }
 0x30a   : > { %v1003_v34 = vsel %vm1002_vm12, %v1000_v37, -inf }
 0x30b   : > { %1004 = vmax.xlane.f32.xlu2 %v1003_v34 }
 0x310   : > { %v997_v40 = vpop.f32.mrf.mxu0 }
 0x311   : > { %v1001_v43 = vsel %vm906_vm13, -inf, %v997_v40 }
 0x312   : > { %v1006_v44 = vsel %vm1002_vm12, %v1001_v43, -inf }
 0x313   : > { %1007 = vmax.xlane.f32.xlu0 %v1006_v44 }
 0x323   : > { %1204 = vrot.lane.b32.xlu2 %v3115_v52, %s2630_s13 }
 0x327   : > { %1344 = vrot.lane.b32.xlu0 %v3115_v52, %s2631_s30 }
 0x32b   : > { %v1111_v49 = vpop.f32.mrf.mxu2 }
 0x32c   : > { %v1117_v42 = vsel %vm905_vm11, -inf, %v1111_v49 }
 0x32d   : > { %v1119_v51 = vsel %vm1002_vm12, %v1117_v42, -inf }
 0x32f   : > { %2255 = vrot.lane.b32.xlu0 %v2254_v47, %s2629_s17 }
 0x340   : > { %v1114_v52 = vpop.f32.mrf.mxu2 }
 0x341   : > { %v1118_v54 = vsel %vm906_vm13, -inf, %v1114_v52 }
 0x342   : > { %v1122_v55 = vsel %vm1002_vm12, %v1118_v54, -inf }
 0x34c   : > { %1120 = vmax.xlane.f32.xlu2 %v1119_v51 }
 0x359   : > { %1123 = vmax.xlane.f32.xlu0 %v1122_v55 }
 0x362   : > { %v1399_v41 = vpop.f32.mrf.mxu0 }
 0x363   : > { %v1405_v4 = vsel %vm905_vm11, -inf, %v1399_v41 }
 0x364   : > { %2280 = vrot.lane.b32.xlu2 %v2254_v47, %s2630_s13  ;;  %v1407_v56 = vsel %vm1002_vm12, %v1405_v4, -inf }
 0x36c   : > { %2290 = vrot.lane.b32.xlu2 %v2259_v45, %s2630_s13 }
 0x36d   : > { %2285 = vrot.lane.b32.xlu0 %v2254_v47, %s2631_s30 }
 0x374   : > { %2295 = vrot.lane.b32.xlu2 %v2259_v45, %s2631_s30 }
 0x37c   : > { %2300 = vrot.lane.b32.xlu2 %v3197_v31, %s2630_s13  ;;  %s2055_s13 = sshll.u32 %s2599_s28, 1  ;;  %s1829_s28 = sshll.u32 %s2841_s16, 4  ;;  %s1830_s28 = int_to_ptr.vmem [resolvable:$true] %s1829_s28 }
 0x37e   : > { %v1005_v59 = vpop.xlane.xlu2 %1004 }
 0x37f   : > { %v1009_v60 = vsub.f32 %v1000_v37, %v1005_v59 }
 0x381   : > { %v1011_v61 = vmul.f32 1.442695, %v1009_v60 }
 0x383   : > { %2313 = vpow2.f32 %v1011_v61 }
 0x386   : > { %v1008_v50 = vpop.xlane.xlu0 %1007  ;;  %v1205_v7 = vpop.permute.xlu2 %1204 }
 0x387   : > { %v1010_v53 = vsub.f32 %v1001_v43, %v1008_v50 }
 0x389   : > { %v3219_v46 = vpop.eup %2313  ;;  %v1013_v2 = vmul.f32 1.442695, %v1010_v53 }
 0x38a   : > { %2010 = vmatmul.msk.f32.vlgmr.msra.gmra.mxu1 %vm1002_vm12, %v3219_v46  ;;  %v1015_v33 = vsel %vm1002_vm12, %v3219_v46, 0.0 }
 0x38b   : > { %2315 = vpow2.f32 %v1013_v2 }
 0x391   : > { %v3223_v3 = vpop.eup %2315 }
 0x392   : > { %2011 = vmatmul.msk.f32.gmra.mxu1 %vm1002_vm12, %v3223_v3 }
 0x397   : > { %1408 = vmax.xlane.f32.xlu0 %v1407_v56 }
 0x399   : > { %v1345_v5 = vpop.permute.xlu0 %1344 }
 0x39a   : > { %2032 = vmatmul.msk.f32.vlgmr.msrb.gmra.mxu1 %vm954_vm0, %v1203_v58  ;;  %2045 = vmatmul.msk.f32.gmra.mxu0 %vm954_vm0, %v1345_v5 }
 0x3a1   : > { %v2256_v57 = vpop.permute.xlu0 %2255 }
 0x3a2   : > { %2033 = vmatmul.msk.f32.gmra.mxu1 %vm954_vm0, %v1205_v7  ;;  %v2257_v9 = vunpack.i.l.bf16 %v2256_v57  ;;  %v2258_v10 = vunpack.i.h.bf16 %v2256_v57 }
 0x3a4   : > { %1187 = vmatpush.msra.mxu3 %v2257_v9 }
 0x3a6   : > { %1188 = vmatpush.msra.mxu3 %v2258_v10 }
 0x3a8   : > { %1189 = vmatpush.msra.mxu3 %v2262_v11 }
 0x3aa   : > { %1190 = vmatpush.msra.mxu3 %v2263_v13 }
 0x3ac   : > { %1191 = vmatpush.msra.mxu3 %v2267_v14 }
 0x3ae   : > { %1192 = vmatpush.msra.mxu3 %v2268_v15 }
 0x3b0   : > { %1325 = vmatpush.msrb.mxu3 %v2272_v25 }
 0x3b2   : > { %1326 = vmatpush.msrb.mxu3 %v2273_v26 }
 0x3bf   : > { %v1121_v16 = vpop.xlane.xlu2 %1120 }
 0x3c0   : > { %v1125_v1 = vsub.f32 %v1117_v42, %v1121_v16  ;;  %v2276_v42 = vpop.permute.xlu1 %2275 }
 0x3c1   : > { %v2277_v51 = vunpack.i.l.bf16 %v2276_v42  ;;  %v2278_v32 = vunpack.i.h.bf16 %v2276_v42 }
 0x3c2   : > { %v1127_v8 = vmul.f32 1.442695, %v1125_v1 }
 0x3c3   : > { %1465 = vmatpush.msrb.mxu2 %v2277_v51 }
 0x3c4   : > { %2317 = vpow2.f32 %v1127_v8 }
 0x3c5   : > { %1466 = vmatpush.msrb.mxu2 %v2278_v32  ;;  %v1518_v32 = vld [vmem:[#allocation9 + $0x20] sm:$0xff] }
 0x3c7   : > { %v2281_v27 = vpop.permute.xlu2 %2280 }
 0x3c8   : > { %v2282_v35 = vunpack.i.l.bf16 %v2281_v27  ;;  %v2283_v37 = vunpack.i.h.bf16 %v2281_v27 }
 0x3ca   : > { %v2318_v17 = vpop.eup %2317  ;;  %1327 = vmatpush.msrb.mxu3 %v2282_v35 }
 0x3cb   : > { %2022 = vmatmul.msk.f32.vlgmr.msra.gmra.mxu3 %vm1002_vm12, %v2318_v17  ;;  %v1131_v29 = vsel %vm1002_vm12, %v2318_v17, 0.0  ;;  %v1018_v17 = vsel %vm1002_vm12, %v3223_v3, 0.0 }
 0x3cc   : > { %v1124_v18 = vpop.xlane.xlu0 %1123  ;;  %1132 = vadd.xlane.f32.xlu2 %v1131_v29  ;;  %1328 = vmatpush.msrb.mxu3 %v2283_v37 }
 0x3cd   : > { %v1126_v22 = vsub.f32 %v1118_v54, %v1124_v18 }
 0x3cf   : > { %v1129_v19 = vmul.f32 1.442695, %v1126_v22  ;;  %v2291_v40 = vpop.permute.xlu2 %2290 }
 0x3d0   : > { %v2292_v52 = vunpack.i.l.bf16 %v2291_v40  ;;  %v2293_v55 = vunpack.i.h.bf16 %v2291_v40 }
 0x3d1   : > { %2319 = vpow2.f32 %v1129_v19 }
 0x3d2   : > { %1329 = vmatpush.msrb.mxu3 %v2292_v52  ;;  %v1521_v52 = vld [vmem:[#allocation9 + $0x38] sm:$0xff] }
 0x3d4   : > { %1330 = vmatpush.msrb.mxu3 %v2293_v55  ;;  %v1519_v55 = vld [vmem:[#allocation9 + $0x28] sm:$0xff] }
 0x3d7   : > { %v2320_v20 = vpop.eup %2319  ;;  %v2296_v63 = vpop.permute.xlu2 %2295 }
 0x3d8   : > { %2023 = vmatmul.msk.f32.gmra.mxu3 %vm1002_vm12, %v2320_v20  ;;  %v1134_v21 = vsel %vm1002_vm12, %v2320_v20, 0.0  ;;  %v2297_v50 = vunpack.i.l.bf16 %v2296_v63  ;;  %v2298_v53 = vunpack.i.h.bf16 %v2296_v63 }
 0x3d9   : > { %1135 = vadd.xlane.f32.xlu2 %v1134_v21 }
 0x3df   : > { %v2286_v28 = vpop.permute.xlu0 %2285  ;;  %v2301_v38 = vpop.permute.xlu2 %2300 }
 0x3e0   : > { %v2287_v60 = vunpack.i.l.bf16 %v2286_v28  ;;  %v2288_v0 = vunpack.i.h.bf16 %v2286_v28  ;;  %v2302_v2 = vunpack.i.l.bf16 %v2301_v38  ;;  %v2303_v41 = vunpack.i.h.bf16 %v2301_v38 }
 0x3e2   : > { %1467 = vmatpush.msrb.mxu2 %v2287_v60  ;;  %1331 = vmatpush.msrb.mxu3 %v2302_v2  ;;  %v1515_v60 = vld [vmem:[#allocation9 + $0x8] sm:$0xff] }
 0x3e4   : > { %1468 = vmatpush.msrb.mxu2 %v2288_v0  ;;  %1332 = vmatpush.msrb.mxu3 %v2303_v41 }
 0x3e6   : > { %1469 = vmatpush.msrb.mxu2 %v2297_v50  ;;  %1540 = vmatpush.msra.mxu3 %v1521_v52  ;;  %v1622_v52 = vld [vmem:[%s3521_s9 + $0x10] sm:$0xff] }
 0x3e8   : > { %1470 = vmatpush.msrb.mxu2 %v2298_v53 }
 0x407   : > { %v3240_v23 = vpop.f32.mrf.mxu1 }
 0x40a   : > { %v1409_v30 = vpop.xlane.xlu0 %1408 }
 0x40b   : > { %v1413_v34 = vsub.f32 %v1405_v4, %v1409_v30 }
 0x40d   : > { %v1415_v39 = vmul.f32 1.442695, %v1413_v34 }
 0x40f   : > { %v3242_v36 = vpop.f32.mrf.mxu1  ;;  %2321 = vpow2.f32 %v1415_v39 }
 0x415   : > { %v3252_v54 = vpop.eup %2321 }
 0x416   : > { %v1419_v61 = vsel %vm1002_vm12, %v3252_v54, 0.0 }
 0x417   : > { %v1259_v43 = vpop.f32.mrf.mxu1  ;;  %v1402_v44 = vpop.f32.mrf.mxu0 }
 0x418   : > { %v1265_v45 = vsel %vm905_vm11, -inf, %v1259_v43  ;;  %v1406_v47 = vsel %vm906_vm13, -inf, %v1402_v44 }
 0x419   : > { %v1410_v48 = vsel %vm1002_vm12, %v1406_v47, -inf  ;;  %v1267_v49 = vsel %vm1002_vm12, %v1265_v45, -inf }
 0x41a   : > { %1411 = vmax.xlane.f32.xlu0 %v1410_v48  ;;  %1268 = vmax.xlane.f32.xlu1 %v1267_v49 }
 0x41f   : > { %v1262_v58 = vpop.f32.mrf.mxu1 }
 0x420   : > { %v1266_v59 = vsel %vm906_vm13, -inf, %v1262_v58  ;;  %v1517_v58 = vld [vmem:[#allocation9 + $0x18] sm:$0xff] }
 0x421   : > { %v1270_v62 = vsel %vm1002_vm12, %v1266_v59, -inf }
 0x422   : > { %1420 = vadd.xlane.f32.xlu0 %v1419_v61  ;;  %1271 = vmax.xlane.f32.xlu1 %v1270_v62  ;;  %v1514_v61 = vld [vmem:[#allocation9] sm:$0xff] }
 0x42a   : > { %1016 = vadd.xlane.f32.xlu0 %v1015_v33 }
 0x43b   : > { %2305 = vrot.lane.b32.xlu1 %v3197_v31, %s2631_s30  ;;  %s2056_s30 = sshll.u32 %s2603_s29, 3 }
 0x43f   : > { %v1133_v4 = vpop.xlane.xlu2 %1132 }
 0x440   : > { %2323 = vrcp.f32 %v1133_v4 }
 0x446   : > { %v2324_v56 = vpop.eup %2323 }
 0x44c   : > { %v1136_v18 = vpop.xlane.xlu2 %1135 }
 0x44e   : > { %v1194_v5 = vpop.f32.mrf.mxu3 }
 0x44f   : > { %v1200_v6 = vmul.f32 %v2324_v56, %v1194_v5 }
 0x451   : > { %1484 = vrot.lane.b32.xlu0 %v1200_v6, %s2628_s27 }
 0x45b   : > { %v1197_v21 = vpop.f32.mrf.mxu3 }
 0x48d   : > { %v1412_v7 = vpop.xlane.xlu0 %1411  ;;  %v1269_v57 = vpop.xlane.xlu1 %1268 }
 0x48e   : > { %v1414_v46 = vsub.f32 %v1406_v47, %v1412_v7  ;;  %v1273_v9 = vsub.f32 %v1265_v45, %v1269_v57 }
 0x490   : > { %v1417_v10 = vmul.f32 1.442695, %v1414_v46  ;;  %v1275_v11 = vmul.f32 1.442695, %v1273_v9  ;;  %v2309_v46 = vld [vmem:[%s3518_s6] ss:$0 sm:$0xff] }
 0x492   : > { %2325 = vpow2.f32 %v1417_v10  ;;  %v895_v10 = vld [vmem:[%s894_s25] sm:$0xff] }
 0x493   : > { %2327 = vpow2.f32 %v1275_v11 }
 0x495   : > { %v1272_v12 = vpop.xlane.xlu1 %1271  ;;  %v1421_v3 = vpop.xlane.xlu0 %1420 }
 0x496   : > { %v1274_v13 = vsub.f32 %v1266_v59, %v1272_v12  ;;  %v1516_v59 = vld [vmem:[#allocation9 + $0x10] sm:$0xff] }
 0x498   : > { %v2326_v14 = vpop.eup %2325  ;;  %v1277_v15 = vmul.f32 1.442695, %v1274_v13 }
 0x499   : > { %v2328_v31 = vpop.eup %2327  ;;  %v1422_v16 = vsel %vm1002_vm12, %v2326_v14, 0.0 }
 0x49a   : > { %2329 = vpow2.f32 %v1277_v15  ;;  %2034 = vmatmul.msk.f32.vlgmr.msrb.gmra.mxu3 %vm1002_vm12, %v2328_v31  ;;  %v1279_v1 = vsel %vm1002_vm12, %v2328_v31, 0.0  ;;  %1423 = vadd.xlane.f32.xlu2 %v1422_v16 }
 0x49b   : > { %1280 = vadd.xlane.f32.xlu1 %v1279_v1  ;;  %2331 = vrcp.f32 %v1136_v18  ;;  %v2632_v1 = vmov 64.0  }
 0x49d   : > { %v1017_v25 = vpop.xlane.xlu0 %1016 }
 0x4a0   : > { %v2330_v8 = vpop.eup %2329 }
 0x4a1   : > { %v1282_v29 = vsel %vm1002_vm12, %v2330_v8, 0.0  ;;  %v2332_v28 = vpop.eup %2331 }
 0x4a2   : > { %2035 = vmatmul.msk.f32.gmra.mxu3 %vm1002_vm12, %v2330_v8  ;;  %1019 = vadd.xlane.f32.xlu2 %v1018_v17  ;;  %v1201_v24 = vmul.f32 %v2332_v28, %v1197_v21 }
 0x4a3   : > { %1283 = vadd.xlane.f32.xlu0 %v1282_v29 }
 0x4ad   : > { %v2306_v22 = vpop.permute.xlu1 %2305 }
 0x4ae   : > { %v2307_v19 = vunpack.i.l.bf16 %v2306_v22  ;;  %v2308_v20 = vunpack.i.h.bf16 %v2306_v22 }
 0x4b0   : > { %1471 = vmatpush.msrb.mxu2 %v2307_v19 }
 0x4b2   : > { %1472 = vmatpush.msrb.mxu2 %v2308_v20 }
 0x4b3   : > { %2046 = vmatmul.msk.f32.vlgmr.msrb.gmra.mxu2 %vm1002_vm12, %v3252_v54  ;;  %v1520_v54 = vld [vmem:[#allocation9 + $0x30] sm:$0xff] }
 0x4b4   : > { %1541 = vmatpush.msra.mxu3 %v1520_v54  ;;  %v1623_v54 = vld [vmem:[%s3521_s9 + $0x18] sm:$0xff] }
 0x4b6   : > { %1542 = vmatpush.msra.mxu3 %v1519_v55  ;;  %v1620_v55 = vld [vmem:[%s3521_s9] sm:$0xff] }
 0x4b7   : > { %1486 = vrot.lane.b32.xlu0 %v1201_v24, %s2628_s27 }
 0x4b8   : > { %1543 = vmatpush.msra.mxu3 %v1518_v32  ;;  %v1621_v32 = vld [vmem:[%s3521_s9 + $0x8] sm:$0xff] }
 0x4ba   : > { %1544 = vmatpush.msra.mxu3 %v1517_v58 }
 0x4bb   : > { %2047 = vmatmul.msk.f32.gmra.mxu2 %vm1002_vm12, %v2326_v14  ;;  %v896_v14 = vld [vmem:[%s894_s25 + $0x8] sm:$0xff]  ;;  %s1826_s25 = sadd.s32 %s2056_s30, %s2055_s13 }
 0x4bc   : > { %1545 = vmatpush.msra.mxu3 %v1516_v59  ;;  %s2057_s19 = sshll.u32 %s1826_s25, 3 }
 0x4be   : > { %1546 = vmatpush.msra.mxu3 %v1515_v60 }
 0x4c0   : > { %1547 = vmatpush.msra.mxu3 %v1514_v61  ;;  %v1745_v61 = vld [vmem:[%s3523_s11 + $0x78] sm:$0xff] }
 0x4c2   : > { %1766 = vmatpush.msrb.mxu3 %v1745_v61 }
 0x4c3   : > { %v1485_v26 = vpop.permute.xlu0 %1484 }
 0x50d   : > { %v1424_v44 = vpop.xlane.xlu2 %1423 }
 0x50e   : > { %v1281_v27 = vpop.xlane.xlu1 %1280 }
 0x50f   : > { %2333 = vrcp.f32 %v1281_v27 }
 0x515   : > { %v2334_v35 = vpop.eup %2333  ;;  %v1020_v62 = vpop.xlane.xlu2 %1019 }
 0x516   : > { %v1284_v30 = vpop.xlane.xlu0 %1283 }
 0x517   : > { %2335 = vrcp.f32 %v1284_v30 }
 0x518   : > { %2337 = vrcp.f32 %v1421_v3 }
 0x519   : > { %2339 = vrcp.f32 %v1424_v44  ;;  %v1631_v44 = vld [vmem:[%s3521_s9 + $0x58] sm:$0xff] }
 0x51a   : > { %2341 = vrcp.f32 %v1017_v25 }
 0x51b   : > { %2343 = vrcp.f32 %v1020_v62  ;;  %v1744_v62 = vld [vmem:[%s3523_s11 + $0x70] sm:$0xff] }
 0x51c   : > { %2345 = vrcp.f32 %v2632_v1  ;;  %1767 = vmatpush.msrb.mxu3 %v1744_v62 }
 0x51d   : > { %v1334_v37 = vpop.f32.mrf.mxu3  ;;  %v2336_v39 = vpop.eup %2335 }
 0x51e   : > { %v1340_v34 = vmul.f32 %v2334_v35, %v1334_v37  ;;  %v2338_v45 = vpop.eup %2337  ;;  %v1634_v37 = vld [vmem:[%s3521_s9 + $0x70] sm:$0xff] }
 0x51f   : > { %v2340_v49 = vpop.eup %2339  ;;  %1656 = vmatpush.msra.mxu1 %v1634_v37  ;;  %v1753_v37 = vld [vmem:[%s3523_s11 + $0xb8] sm:$0xff] }
 0x520   : > { %1492 = vrot.lane.b32.xlu2 %v1340_v34, %s2627_s20  ;;  %v2342_v63 = vpop.eup %2341  ;;  %v1635_v34 = vld [vmem:[%s3521_s9 + $0x78] sm:$0xff] }
 0x521   : > { %v1052_v50 = vmul.f32 %v2342_v63, %v3240_v23  ;;  %v2344_v38 = vpop.eup %2343  ;;  %1679 = vmatpush.msra.mxu2 %v1635_v34  ;;  %v1761_v63 = vld [vmem:[%s3523_s11 + $0xf8] sm:$0xff] }
 0x522   : > { %v1053_v56 = vmul.f32 %v2344_v38, %v3242_v36  ;;  %v2346_v8 = vpop.eup %2345  ;;  %1789 = vmatpush.msra.mxu0 %v1761_v63  ;;  %v1733_v34 = vld [vmem:[%s3523_s11 + $0x18] sm:$0xff] }
 0x523   : > { %v1506_v33 = vsel %vm954_vm0, %v1052_v50, %v1485_v26  ;;  %v1564_v17 = vmul.f32 64.0, %v2346_v8  ;;  %vm1568_vm1 = vweird.f32 %v2346_v8 }
 0x525   : > { %v1337_v40 = vpop.f32.mrf.mxu3  ;;  %v1565_v29 = vsub.f32 1.0, %v1564_v17  ;;  %v1741_v17 = vld [vmem:[%s3523_s11 + $0x58] sm:$0xff] }
 0x526   : > { %v1341_v43 = vmul.f32 %v2336_v39, %v1337_v40  ;;  %v1632_v39 = vld [vmem:[%s3521_s9 + $0x60] sm:$0xff]  ;;  %v1633_v40 = vld [vmem:[%s3521_s9 + $0x68] sm:$0xff] }
 0x527   : > { %v1566_v18 = vmul.f32 %v2346_v8, %v1565_v29  ;;  %1657 = vmatpush.msra.mxu1 %v1632_v39  ;;  %1680 = vmatpush.msra.mxu2 %v1633_v40  ;;  %v1760_v29 = vld [vmem:[%s3523_s11 + $0xf0] sm:$0xff] }
 0x528   : > { %1494 = vrot.lane.b32.xlu0 %v1341_v43, %s2627_s20  ;;  %v1630_v43 = vld [vmem:[%s3521_s9 + $0x50] sm:$0xff]  ;;  %1790 = vmatpush.msra.mxu0 %v1760_v29  ;;  %s3564_s20 = sld [smem:[#allocation29_spill]] }
 0x529   : > { %v1487_v0 = vpop.permute.xlu0 %1486  ;;  %v1567_v22 = vadd.f32 %v2346_v8, %v1566_v18  ;;  %1658 = vmatpush.msra.mxu1 %v1630_v43  ;;  %1681 = vmatpush.msra.mxu2 %v1631_v44  ;;  %v1740_v18 = vld [vmem:[%s3523_s11 + $0x50] sm:$0xff]  ;;  %v1751_v43 = vld [vmem:[%s3523_s11 + $0xa8] sm:$0xff] }
 0x52a   : > { %v1507_v6 = vsel %vm954_vm0, %v1053_v56, %v1487_v0  ;;  %v1743_v0 = vld [vmem:[%s3523_s11 + $0x68] sm:$0xff]  ;;  %v1752_v39 = vld [vmem:[%s3523_s11 + $0xb0] sm:$0xff] }
 0x52b   : > { %v1569_v19 = vsel %vm1568_vm1, %v2346_v8, %v1567_v22  ;;  %1768 = vmatpush.msrb.mxu3 %v1743_v0  ;;  %v1759_v22 = vld [vmem:[%s3523_s11 + $0xe8] sm:$0xff]  ;;  %v1732_v40 = vld [vmem:[%s3523_s11 + $0x10] sm:$0xff] }
 0x52c   : > { %1791 = vmatpush.msra.mxu0 %v1759_v22  ;;  %v1731_v44 = vld [vmem:[%s3523_s11 + $0x8] sm:$0xff] }
 0x52e   : > { %s1828_s27 = scalar_lea.hbm %s3564_s20, %s2057_s19  ;;  %s2529_s30 = scalar_lea.hbm %s3564_s20, 128 }
 0x52f   : > { %s1831_s29 = sshll.u32 %s1828_s27, 4  ;;  %s1832_s29 = int_to_ptr.hbm [resolvable:$true] %s1831_s29 }
 0x530   : > { %s2523_s22 = sshra.s32 %s1832_s29, 4  ;;  %s2524_s22 = int_to_ptr.hbm [resolvable:$true] %s2523_s22 }
 0x531   : > { %s2525_s21 = scalar_lea.hbm %s2524_s22, 16  ;;  %p2530_p7 = scmp.lt.s32.totalorder %s2524_s22, %s3564_s20 }
 0x532   : > { %p2526_p4 = scmp.ne.s32.totalorder %s2524_s22, %s2525_s21  ;;  %p2531_p9 = scmp.lt.s32.totalorder %s2529_s30, %s2525_s21 }
 0x534   : > { %p2527_p5 = pnand %p2526_p4, %p2757_p3  ;;  %p2532_p10 = por %p2531_p9, %p2530_p7 }
 0x536   : > { %v1474_v47 = vpop.f32.mrf.mxu2  ;;  %p2528_p6 = pneg %p2527_p5 }
 0x537   : > { %v1480_v48 = vmul.f32 %v2338_v45, %v1474_v47  ;;  %v1628_v45 = vld [vmem:[%s3521_s9 + $0x40] sm:$0xff]  ;;  %v1629_v47 = vld [vmem:[%s3521_s9 + $0x48] sm:$0xff] }
 0x538   : > { %1659 = vmatpush.msra.mxu1 %v1628_v45  ;;  %1682 = vmatpush.msra.mxu2 %v1629_v47  ;;  %v1750_v45 = vld [vmem:[%s3523_s11 + $0xa0] sm:$0xff]  ;;  %p2533_p11 = pnand %p2532_p10, %p2528_p6 }
 0x539   : > { %1500 = vrot.lane.b32.xlu1 %v1480_v48, %s2626_s24  ;;  %v1626_v48 = vld [vmem:[%s3521_s9 + $0x30] sm:$0xff]  ;;  %v1730_v47 = vld [vmem:[%s3523_s11] sm:$0xff] }
 0x53a   : > { %1660 = vmatpush.msra.mxu1 %v1626_v48  ;;  %v1749_v48 = vld [vmem:[%s3523_s11 + $0x98] sm:$0xff] }
 0x53e   : > { %v1477_v42 = vpop.f32.mrf.mxu2 }
 0x53f   : > { %v1481_v51 = vmul.f32 %v2340_v49, %v1477_v42  ;;  %v1627_v49 = vld [vmem:[%s3521_s9 + $0x38] sm:$0xff]  ;;  %v1624_v42 = vld [vmem:[%s3521_s9 + $0x20] sm:$0xff] }
 0x540   : > { %1683 = vmatpush.msra.mxu2 %v1627_v49  ;;  %1661 = vmatpush.msra.mxu1 %v1624_v42  ;;  %v1748_v49 = vld [vmem:[%s3523_s11 + $0x90] sm:$0xff]  ;;  %v1747_v42 = vld [vmem:[%s3523_s11 + $0x88] sm:$0xff] }
 0x541   : > { %1502 = vrot.lane.b32.xlu2 %v1481_v51, %s2626_s24  ;;  %v1625_v51 = vld [vmem:[%s3521_s9 + $0x28] sm:$0xff] }
 0x542   : > { %1684 = vmatpush.msra.mxu2 %v1625_v51  ;;  %1662 = vmatpush.msra.mxu1 %v1622_v52  ;;  %v1636_v51 = vld [vmem:[%s3522_s10] sm:$0x3] }
 0x543   : > { %v1746_v52 = vld [vmem:[%s3523_s11 + $0x80] sm:$0xff] }
 0x544   : > { %1685 = vmatpush.msra.mxu2 %v1623_v54  ;;  %1663 = vmatpush.msra.mxu1 %v1620_v55  ;;  %v1638_v54 = vperm.slane %v1636_v51, 0 }
 0x546   : > { %1686 = vmatpush.msra.mxu2 %v1621_v32  ;;  %2078 = vmatpush.msrb.mxu1 %v1761_v63 }
 0x548   : > { %2079 = vmatpush.msrb.mxu1 %v1760_v29 }
 0x54a   : > { %2080 = vmatpush.msrb.mxu1 %v1759_v22 }
 0x57a   : > { %v1493_v53 = vpop.permute.xlu2 %1492 }
 0x57b   : > { %v1509_v2 = vsel %vm1508_vm14, %v1506_v33, %v1493_v53  ;;  %v1742_v33 = vld [vmem:[%s3523_s11 + $0x60] sm:$0xff] }
 0x57c   : > { %1769 = vmatpush.msrb.mxu3 %v1742_v33 }
 0x57e   : > { %1770 = vmatpush.msrb.mxu3 %v1741_v17 }
 0x580   : > { %1771 = vmatpush.msrb.mxu3 %v1740_v18 }
 0x59a   : > { %v1495_v5 = vpop.permute.xlu0 %1494 }
 0x59b   : > { %v1510_v7 = vsel %vm1508_vm14, %v1507_v6, %v1495_v5  ;;  %v1503_v23 = vpop.permute.xlu2 %1502 }
 0x59c   : > { %v1513_v57 = vsel %vm1511_vm15, %v1510_v7, %v1503_v23 }
 0x5ab   : > { %v1501_v41 = vpop.permute.xlu1 %1500 }
 0x5ac   : > { %v1512_v4 = vsel %vm1511_vm15, %v1509_v2, %v1501_v41 }
 0x5ad   : > { %2048 = vmatmul.msk.f32.vlgmr.msra.gmra.mxu3 %vm1002_vm12, %v1512_v4 }
 0x5b5   : > { %2049 = vmatmul.msk.f32.gmra.mxu3 %vm1002_vm12, %v1513_v57  ;;  %v2310_v57 = vld [vmem:[%s3519_s7] ss:$0 sm:$0xff] }
 0x630   : > { %v1549_v9 = vpop.f32.mrf.mxu3 }
 0x631   : > { %v1550_v11 = vadd.f32 %v2309_v46, %v1549_v9 }
 0x633   : > { %v1555_v12 = vadd.f32 %v1550_v11, %v895_v10  ;;  %v2311_v11 = vld [vmem:[#allocation11] ss:$0 sm:$0xff] }
 0x635   : > { %v1557_v13 = vsel %vm1002_vm12, %v1555_v12, 0.0 }
 0x636   : > { %1558 = vadd.xlane.f32.xlu1 %v1557_v13 }
 0x638   : > { %v1552_v36 = vpop.f32.mrf.mxu3 }
 0x639   : > { %v1553_v15 = vadd.f32 %v2309_v46, %v1552_v36 }
 0x63b   : > { %v1556_v31 = vadd.f32 %v1553_v15, %v896_v14 }
 0x63d   : > { %v1560_v16 = vsel %vm1002_vm12, %v1556_v31, 0.0 }
 0x63e   : > { %1561 = vadd.xlane.f32.xlu0 %v1560_v16 }
 0x6a9   : > { %v1559_v20 = vpop.xlane.xlu1 %1558 }
 0x6aa   : > { %v1570_v21 = vmul.f32 %v1569_v19, %v1559_v20  ;;  %v1758_v20 = vld [vmem:[%s3523_s11 + $0xe0] sm:$0xff] }
 0x6ab   : > { %1792 = vmatpush.msra.mxu0 %v1758_v20  ;;  %2081 = vmatpush.msrb.mxu1 %v1758_v20 }
 0x6ac   : > { %v3293_v28 = vsub.f32 %v1555_v12, %v1570_v21  ;;  %v1738_v21 = vld [vmem:[%s3523_s11 + $0x40] sm:$0xff] }
 0x6ae   : > { %v1574_v24 = vmul.f32 %v3293_v28, %v3293_v28 }
 0x6b0   : > { %v1576_v3 = vsel %vm1002_vm12, %v1574_v24, 0.0  ;;  %v1737_v24 = vld [vmem:[%s3523_s11 + $0x38] sm:$0xff] }
 0x6b1   : > { %v1562_v25 = vpop.xlane.xlu0 %1561  ;;  %1577 = vadd.xlane.f32.xlu2 %v1576_v3  ;;  %v1756_v3 = vld [vmem:[%s3523_s11 + $0xd0] sm:$0xff] }
 0x6b2   : > { %v1571_v26 = vmul.f32 %v1569_v19, %v1562_v25  ;;  %v1736_v25 = vld [vmem:[%s3523_s11 + $0x30] sm:$0xff] }
 0x6b4   : > { %v3298_v27 = vsub.f32 %v1556_v31, %v1571_v26  ;;  %v1755_v26 = vld [vmem:[%s3523_s11 + $0xc8] sm:$0xff] }
 0x6b6   : > { %v1575_v30 = vmul.f32 %v3298_v27, %v3298_v27 }
 0x6b8   : > { %v1579_v35 = vsel %vm1002_vm12, %v1575_v30, 0.0  ;;  %v1754_v30 = vld [vmem:[%s3523_s11 + $0xc0] sm:$0xff] }
 0x6b9   : > { %1580 = vadd.xlane.f32.xlu1 %v1579_v35  ;;  %v1734_v35 = vld [vmem:[%s3523_s11 + $0x20] sm:$0xff] }
 0x724   : > { %v1578_v58 = vpop.xlane.xlu2 %1577 }
 0x725   : > { %v1582_v59 = vmul.f32 %v1578_v58, %v1569_v19 }
 0x727   : > { %v1584_v60 = vadd.f32 1e-05, %v1582_v59  ;;  %v1639_v59 = vperm.slane %v1636_v51, 1 }
 0x729   : > { %2347 = vrsqrt.f32 %v1584_v60  ;;  %vm1592_vm3 = vweird.f32 %v1584_v60 }
 0x72c   : > { %v1581_v50 = vpop.xlane.xlu1 %1580 }
 0x72d   : > { %v1583_v53 = vmul.f32 %v1581_v50, %v1569_v19  ;;  %v1739_v19 = vld [vmem:[%s3523_s11 + $0x48] sm:$0xff] }
 0x72e   : > { %1772 = vmatpush.msrb.mxu3 %v1739_v19 }
 0x72f   : > { %v2348_v38 = vpop.eup %2347  ;;  %v1585_v2 = vadd.f32 1e-05, %v1583_v53 }
 0x730   : > { %v1587_v41 = vmul.f32 %v2348_v38, %v1584_v60  ;;  %vm1593_vm2 = vweird.f32 %v2348_v38  ;;  %1773 = vmatpush.msrb.mxu3 %v1738_v21 }
 0x731   : > { %2349 = vrsqrt.f32 %v1585_v2  ;;  %vm1594_vm4 = vmor %vm1592_vm3, %vm1593_vm2  ;;  %vm1602_vm6 = vweird.f32 %v1585_v2 }
 0x732   : > { %v1588_v4 = vmul.f32 %v2348_v38, %v1587_v41  ;;  %1774 = vmatpush.msrb.mxu3 %v1737_v24 }
 0x734   : > { %v1589_v56 = vmul.f32 0.5, %v1588_v4  ;;  %1775 = vmatpush.msrb.mxu3 %v1736_v25  ;;  %v2312_v25 = vld [vmem:[%s3524_s12] ss:$0 sm:$0xff] }
 0x736   : > { %v1590_v5 = vsub.f32 1.5, %v1589_v56 }
 0x737   : > { %v2350_v6 = vpop.eup %2349 }
 0x738   : > { %v1591_v7 = vmul.f32 %v2348_v38, %v1590_v5  ;;  %v1597_v23 = vmul.f32 %v2350_v6, %v1585_v2  ;;  %vm1603_vm5 = vweird.f32 %v2350_v6 }
 0x739   : > { %vm1604_vm7 = vmor %vm1602_vm6, %vm1603_vm5 }
 0x73a   : > { %v1595_v46 = vsel %vm1594_vm4, %v2348_v38, %v1591_v7  ;;  %v1598_v9 = vmul.f32 %v2350_v6, %v1597_v23 }
 0x73b   : > { %v1606_v10 = vmul.f32 %v1595_v46, %v3293_v28  ;;  %v1757_v28 = vld [vmem:[%s3523_s11 + $0xd8] sm:$0xff] }
 0x73c   : > { %v1599_v12 = vmul.f32 0.5, %v1598_v9  ;;  %1793 = vmatpush.msra.mxu0 %v1757_v28  ;;  %2082 = vmatpush.msrb.mxu1 %v1757_v28 }
 0x73d   : > { %v1612_v13 = vmul.f32 %v2310_v57, %v1606_v10 }
 0x73e   : > { %v1600_v36 = vsub.f32 1.5, %v1599_v12  ;;  %1794 = vmatpush.msra.mxu0 %v1756_v3  ;;  %2083 = vmatpush.msrb.mxu1 %v1756_v3 }
 0x73f   : > { %v1618_v14 = vadd.f32 %v2311_v11, %v1612_v13 }
 0x740   : > { %v1601_v15 = vmul.f32 %v2350_v6, %v1600_v36  ;;  %1795 = vmatpush.msra.mxu0 %v1755_v26  ;;  %2084 = vmatpush.msrb.mxu1 %v1755_v26 }
 0x741   : > { %2050 = vmatmul.msk.f32.vlgmr.msra.gmra.mxu1 %vm1002_vm12, %v1618_v14  ;;  %2052 = vmatmul.msk.f32.vlgmr.msra.gmra.mxu2 %vm1002_vm12, %v1618_v14 }
 0x742   : > { %v1605_v31 = vsel %vm1604_vm7, %v2350_v6, %v1601_v15  ;;  %1796 = vmatpush.msra.mxu0 %v1754_v30  ;;  %2085 = vmatpush.msrb.mxu1 %v1754_v30 }
 0x743   : > { %v1607_v16 = vmul.f32 %v1605_v31, %v3298_v27  ;;  %v1735_v27 = vld [vmem:[%s3523_s11 + $0x28] sm:$0xff] }
 0x744   : > { %1776 = vmatpush.msrb.mxu3 %v1735_v27  ;;  %1797 = vmatpush.msra.mxu0 %v1753_v37 }
 0x745   : > { %v1613_v1 = vmul.f32 %v2310_v57, %v1607_v16  ;;  %2086 = vmatpush.msrb.mxu1 %v1753_v37 }
 0x746   : > { %1777 = vmatpush.msrb.mxu3 %v1734_v35  ;;  %1798 = vmatpush.msra.mxu0 %v1752_v39 }
 0x747   : > { %v1619_v8 = vadd.f32 %v2311_v11, %v1613_v1  ;;  %2087 = vmatpush.msrb.mxu1 %v1752_v39 }
 0x748   : > { %1778 = vmatpush.msrb.mxu3 %v1733_v34  ;;  %1799 = vmatpush.msra.mxu0 %v1751_v43 }
 0x749   : > { %2051 = vmatmul.msk.f32.gmra.mxu1 %vm1002_vm12, %v1619_v8  ;;  %2053 = vmatmul.msk.f32.gmra.mxu2 %vm1002_vm12, %v1619_v8 }
 0x74a   : > { %1779 = vmatpush.msrb.mxu3 %v1732_v40  ;;  %2088 = vmatpush.msrb.mxu1 %v1751_v43 }
 0x74b   : > { %1800 = vmatpush.msra.mxu0 %v1750_v45 }
 0x74c   : > { %1780 = vmatpush.msrb.mxu3 %v1731_v44  ;;  %2089 = vmatpush.msrb.mxu1 %v1750_v45 }
 0x74d   : > { %1801 = vmatpush.msra.mxu0 %v1749_v48 }
 0x74e   : > { %1781 = vmatpush.msrb.mxu3 %v1730_v47  ;;  %2090 = vmatpush.msrb.mxu1 %v1749_v48 }
 0x74f   : > { %1802 = vmatpush.msra.mxu0 %v1748_v49 }
 0x750   : > { %2091 = vmatpush.msrb.mxu1 %v1748_v49 }
 0x751   : > { %1803 = vmatpush.msra.mxu0 %v1747_v42 }
 0x752   : > { %2092 = vmatpush.msrb.mxu1 %v1747_v42 }
 0x753   : > { %1804 = vmatpush.msra.mxu0 %v1746_v52 }
 0x754   : > { %2093 = vmatpush.msrb.mxu1 %v1746_v52 }
 0x7be   : > { %v1665_v55 = vpop.f32.mrf.mxu1 }
 0x7bf   : > { %v1666_v32 = vadd.f32 %v1665_v55, %v1638_v54 }
 0x7c1   : > { %v1698_v58 = vmul.f32 0.044715, %v1666_v32  ;;  %v1694_v13 = vmul.f32 0.5, %v1666_v32 }
 0x7c3   : > { %v1702_v60 = vmul.f32 %v1698_v58, %v1666_v32 }
 0x7c4   : > { %v1688_v61 = vpop.f32.mrf.mxu2 }
 0x7c5   : > { %v1706_v62 = vmul.f32 %v1702_v60, %v1666_v32  ;;  %v1689_v63 = vadd.f32 %v1688_v61, %v1639_v59 }
 0x7c6   : > { %v1668_v0 = vpop.f32.mrf.mxu1 }
 0x7c7   : > { %v1699_v50 = vmul.f32 0.044715, %v1689_v63  ;;  %v1669_v53 = vadd.f32 %v1668_v0, %v1638_v54  ;;  %v1710_v33 = vadd.f32 %v1706_v62, %v1666_v32  ;;  %v1695_v8 = vmul.f32 0.5, %v1689_v63 }
 0x7c9   : > { %v1703_v38 = vmul.f32 %v1699_v50, %v1689_v63  ;;  %v1714_v2 = vmul.f32 0.7978846, %v1710_v33  ;;  %v1700_v41 = vmul.f32 0.044715, %v1669_v53  ;;  %v1696_v22 = vmul.f32 0.5, %v1669_v53 }
 0x7cb   : > { %v1707_v4 = vmul.f32 %v1703_v38, %v1689_v63  ;;  %2351 = vtanh.f32 %v1714_v2  ;;  %v1704_v56 = vmul.f32 %v1700_v41, %v1669_v53 }
 0x7cc   : > { %v1691_v5 = vpop.f32.mrf.mxu2 }
 0x7cd   : > { %v1692_v6 = vadd.f32 %v1691_v5, %v1639_v59  ;;  %v1711_v7 = vadd.f32 %v1707_v4, %v1689_v63  ;;  %v1708_v23 = vmul.f32 %v1704_v56, %v1669_v53 }
 0x7cf   : > { %v1701_v57 = vmul.f32 0.044715, %v1692_v6  ;;  %v1715_v46 = vmul.f32 0.7978846, %v1711_v7  ;;  %v1712_v9 = vadd.f32 %v1708_v23, %v1669_v53  ;;  %v1697_v28 = vmul.f32 0.5, %v1692_v6 }
 0x7d1   : > { %v2352_v10 = vpop.eup %2351  ;;  %v1705_v11 = vmul.f32 %v1701_v57, %v1692_v6  ;;  %2353 = vtanh.f32 %v1715_v46  ;;  %v1716_v12 = vmul.f32 0.7978846, %v1712_v9 }
 0x7d2   : > { %v1722_v36 = vadd.f32 1.0, %v2352_v10 }
 0x7d3   : > { %v1709_v14 = vmul.f32 %v1705_v11, %v1692_v6  ;;  %2355 = vtanh.f32 %v1716_v12 }
 0x7d4   : > { %v1726_v15 = vmul.f32 %v1722_v36, %v1694_v13 }
 0x7d5   : > { %v1713_v31 = vadd.f32 %v1709_v14, %v1692_v6 }
 0x7d6   : > { %1782 = vmatmul.f32.vlgmr.msrb.gmra.mxu3 %v1726_v15 }
 0x7d7   : > { %v2354_v16 = vpop.eup %2353  ;;  %v1717_v1 = vmul.f32 0.7978846, %v1713_v31 }
 0x7d8   : > { %v1723_v17 = vadd.f32 1.0, %v2354_v16 }
 0x7d9   : > { %v2356_v29 = vpop.eup %2355  ;;  %2357 = vtanh.f32 %v1717_v1 }
 0x7da   : > { %v1727_v18 = vmul.f32 %v1723_v17, %v1695_v8  ;;  %v1724_v19 = vadd.f32 1.0, %v2356_v29 }
 0x7dc   : > { %1805 = vmatmul.f32.vlgmr.msra.gmra.mxu0 %v1727_v18  ;;  %v1728_v20 = vmul.f32 %v1724_v19, %v1696_v22 }
 0x7de   : > { %1785 = vmatmul.f32.gmra.mxu3 %v1728_v20 }
 0x7df   : > { %v2358_v21 = vpop.eup %2357 }
 0x7e0   : > { %v1725_v24 = vadd.f32 1.0, %v2358_v21 }
 0x7e2   : > { %v1729_v3 = vmul.f32 %v1725_v24, %v1697_v28 }
 0x7e4   : > { %1808 = vmatmul.f32.vlgmr.msrb.gmra.mxu1 %v1729_v3 }
 0x859   : > { %v1783_v26 = vpop.f32.mrf.mxu3  ;;  %v1806_v30 = vpop.f32.mrf.mxu0 }
 0x85a   : > { %v1784_v27 = vadd.f32 %v2312_v25, %v1783_v26 }
 0x85c   : > { %v1807_v35 = vadd.f32 %v1806_v30, %v1784_v27 }
 0x85e   : > { %1812 = vst.msk [vmem:[%s2841_s16] sm:$0xff] %vm1002_vm12, %v1807_v35 }
 0x861   : > { %v1786_v37 = vpop.f32.mrf.mxu3  ;;  %v1809_v39 = vpop.f32.mrf.mxu1 }
 0x862   : > { %v1787_v34 = vadd.f32 %v2312_v25, %v1786_v37 }
 0x864   : > { %v1810_v40 = vadd.f32 %v1809_v39, %v1787_v34 }
 0x866   : > { %1813 = vst.msk [vmem:[%s2841_s16 + $0x8] sm:$0xff] %vm1002_vm12, %v1810_v40 }
 0x867   : > { %2536 = shalt.err (!%p2533_p11)
}
 0x868   : > { %s2633_s5 = smov 128   ;;  %s2634_s16 = smov 8  }
 0x869   : > { %2114 = dma.vmem_to_hbm [thread:$0]  (%p2757_p3), %s1830_s28, 256, %s1832_s29, %s1815_s18, %s2633_s5, %s2633_s5, %s2634_s16  }
 0x86a PF: > { %s3566_s25 = sld [smem:[#allocation21_spill]] }
 0x86b   : > { %s3567_s19 = sld [smem:[#allocation17_spill]] }
 0x870   : > { %p2146_p12 = scmp.ge.s32.totalorder %s3566_s25, 2 }
 0x871   : > { %s1846_s24 = sand.u32 1, %s3567_s19  }
 0x872   : > { %p2133_p13 = pnand %p2146_p12, %p2766_p8  ;;  %s1847_s27 = scalar_lea.sflag [#allocation5], %s1846_s24 }
 0x874   : > { %p2134_p0 = pneg %p2133_p13 }
 0x876   : > { %2582 = dma.done.wait (%p2134_p0), %s1847_s27, 256  }
 0x877   : > { %2584 = vsyncadd (%p2134_p0), %s1847_s27, 4294967040  ;;  %s29_s15 = sadd.s32 1, %s3566_s25   ;;  %s3569_s22 = sld [smem:[#allocation18_spill]] }
 0x878   : > { %p26_p1 = scmp.ge.s32.totalorder %s29_s15, 10   ;;  %s3570_s27 = sld [smem:[#allocation26_spill]] }
 0x879   : > { %s3571_s28 = sld [smem:[#allocation19_spill]]  ;;  %s3575_s25 = smov %s2591_s26 }
 0x87a   : > { %s3572_s29 = sld [smem:[#allocation20_spill]]  ;;  %28 = sbr.rel (!%p26_p1) target bundleno = 12 (0xc), region = 134 }
 0x87b   : > { %s3573_s30 = sld [smem:[#allocation22_spill]] }
 0x87c   : > { %s3574_s14 = sld [smem:[#allocation24_spill]] }
 0x87d   : > { %s3576_s26 = smov %s3569_s22 }
 0x87f   :  { %1853 = vsyncpa [#allocation4], 1 }
 0x880   :  { %1855 = vsyncpa [#allocation4 + $0x1], 1 }
 0x881   :  { %1856 = vsyncpa [#allocation7], 1 }
 0x882   :  { %1857 = vsyncpa [#allocation10], 1 }
 0x883   :  { %1858 = vsyncpa [#allocation5], 1 }
 0x884   :  { %1860 = vsyncpa [#allocation5 + $0x1], 1 }

</bundles_post_ra>
